<compile_context>
chip_gen: v5e
topology: v5e:2x2
jax: 0.10.0
libtpu: 0.0.40
codegen_flags: <defaults>
</compile_context>

<pallas_src>
import functools
import math

import jax
import jax.numpy as jnp
import numpy as np
from jax.experimental import pallas as pl
from jax.experimental.pallas import tpu as pltpu


# ----------------------------------------------------------------------------
# Reference math (pure jnp, f32) — used only to validate the kernel.
# ----------------------------------------------------------------------------
def _layernorm_ref(x, g, b, eps=1e-5):
    mu = jnp.mean(x, axis=-1, keepdims=True)
    var = jnp.mean((x - mu) ** 2, axis=-1, keepdims=True)
    return (x - mu) * jax.lax.rsqrt(var + eps) * g + b


def _mha_ref(x_q, x_kv, wq, bq, wk, bk, wv, bv, wo, bo, num_heads, causal):
    """Reference multi-head attention for ONE batch element."""
    s_q, d_model = x_q.shape
    s_kv = x_kv.shape[0]
    dh = d_model // num_heads
    scale = 1.0 / math.sqrt(dh)

    q = jnp.dot(x_q, wq) + bq
    k = jnp.dot(x_kv, wk) + bk
    v = jnp.dot(x_kv, wv) + bv

    if causal:
        row = jax.lax.broadcasted_iota(jnp.int32, (s_q, s_kv), 0)
        col = jax.lax.broadcasted_iota(jnp.int32, (s_q, s_kv), 1)
        mask = col <= row

    heads = []
    for h in range(num_heads):
        qh = q[:, h * dh:(h + 1) * dh]
        kh = k[:, h * dh:(h + 1) * dh]
        vh = v[:, h * dh:(h + 1) * dh]
        s = jnp.dot(qh, kh.T) * scale
        if causal:
            s = jnp.where(mask, s, -1e30)
        s = s - jnp.max(s, axis=-1, keepdims=True)
        p = jnp.exp(s)
        p = p / jnp.sum(p, axis=-1, keepdims=True)
        heads.append(jnp.dot(p, vh))
    ctx = jnp.concatenate(heads, axis=-1)
    return jnp.dot(ctx, wo) + bo


def _decoder_layer_ref(y, enc, p, num_heads):
    sa = _mha_ref(y, y, p["sa_wq"], p["sa_bq"], p["sa_wk"], p["sa_bk"],
                  p["sa_wv"], p["sa_bv"], p["sa_wo"], p["sa_bo"], num_heads, True)
    x1 = _layernorm_ref(y + sa, p["ln1_g"], p["ln1_b"])
    ca = _mha_ref(x1, enc, p["ca_wq"], p["ca_bq"], p["ca_wk"], p["ca_bk"],
                  p["ca_wv"], p["ca_bv"], p["ca_wo"], p["ca_bo"], num_heads, False)
    x2 = _layernorm_ref(x1 + ca, p["ln2_g"], p["ln2_b"])
    h = jnp.maximum(jnp.dot(x2, p["ff_w1"]) + p["ff_b1"], 0.0)
    ff = jnp.dot(h, p["ff_w2"]) + p["ff_b2"]
    return _layernorm_ref(x2 + ff, p["ln3_g"], p["ln3_b"])


# ----------------------------------------------------------------------------
# In-kernel helpers.
# ----------------------------------------------------------------------------
def _layernorm(x, g, b, eps=1e-5):
    """One-pass statistics: E[x] and E[x^2] reduced independently (no serial
    dependency through mu), var = E[x^2] - mu^2."""
    inv_n = 1.0 / x.shape[-1]
    mu = jnp.sum(x, axis=-1, keepdims=True) * inv_n
    ex2 = jnp.sum(x * x, axis=-1, keepdims=True) * inv_n
    var = ex2 - mu * mu
    return (x - mu) * jax.lax.rsqrt(var + eps) * g + b


def _attend(q, k, v, wo_heads, bias, num_heads):
    """Per-head attention with zero relayouts / transposes.

    q: (Sq, D) f32, k/v: (Skv, D) f32 (already projected, scale folded into q),
    wo_heads: (H, dh, D) bf16, bias: (Sq, Skv) additive f32 or None.
    Returns (Sq, D) f32 = sum_h softmax(q_h k_h^T + bias) v_h @ Wo_h.
    """
    d = q.shape[-1]
    dh = d // num_heads
    q_bf = q.astype(jnp.bfloat16)
    k_bf = k.astype(jnp.bfloat16)
    v_bf = v.astype(jnp.bfloat16)

    out = None
    for hh in range(num_heads):
        lo, hi = hh * dh, (hh + 1) * dh
        # QK^T: contraction over the lane (dh) dim of both operands; the MXU
        # consumes the transposed-RHS form natively (no XLU transpose emitted).
        s = jax.lax.dot_general(q_bf[:, lo:hi], k_bf[:, lo:hi],
                                (((1,), (1,)), ((), ())),
                                preferred_element_type=jnp.float32)
        if bias is not None:
            s = s + bias                         # keep f32 before exp (mask precision)
        s = s - jnp.max(s, axis=-1, keepdims=True)
        p = jnp.exp(s)
        p = p * pl.reciprocal(jnp.sum(p, axis=-1, keepdims=True), approx=True)
        ctx = jnp.dot(p.astype(jnp.bfloat16), v_bf[:, lo:hi],
                      preferred_element_type=jnp.float32)
        # Per-head output projection (replaces _merge_heads entirely).
        contrib = jnp.dot(ctx.astype(jnp.bfloat16), wo_heads[hh],
                          preferred_element_type=jnp.float32)
        out = contrib if out is None else out + contrib
    return out


# ----------------------------------------------------------------------------
# Pallas kernel: full decoder stack, grid = (batch, layers).
# ----------------------------------------------------------------------------
_STACKED_KEYS = (
    "sa_wqkv", "sa_bqkv", "sa_wo", "sa_bo", "ln1_g", "ln1_b",
    "ca_wq", "ca_bq", "ca_wkv", "ca_bkv", "ca_wo", "ca_bo", "ln2_g", "ln2_b",
    "ff_w1", "ff_b1", "ff_w2", "ff_b2", "ln3_g", "ln3_b",
)


def _decoder_stack_kernel(num_heads, y_in_ref, enc_ref, *rest):
    *weight_refs, out_ref, y_scr = rest
    w = dict(zip(_STACKED_KEYS, weight_refs))

    layer = pl.program_id(1)
    s, d = y_scr.shape
    h = num_heads

    # First layer of this batch chunk: pull activations into the resident scratch.
    @pl.when(layer == 0)
    def _():
        y_scr[...] = y_in_ref[0]

    y = y_scr[...]                                   # (S, D) f32, resident across layers
    enc_bf = enc_ref[0].astype(jnp.bfloat16)         # (S_enc, D)

    # Additive causal bias generated in-kernel (cheap VPU iota/compare).
    row = jax.lax.broadcasted_iota(jnp.int32, (s, s), 0)
    col = jax.lax.broadcasted_iota(jnp.int32, (s, s), 1)
    causal_bias = jnp.where(col <= row, 0.0, -1e30).astype(jnp.float32)

    # ----- masked multi-head self-attention (fused QKV matmul, per-head lane slices)
    qkv = jnp.dot(y.astype(jnp.bfloat16), w["sa_wqkv"][0],
                  preferred_element_type=jnp.float32) + w["sa_bqkv"][0]
    sa = _attend(qkv[:, :d], qkv[:, d:2 * d], qkv[:, 2 * d:],
                 w["sa_wo"][0], causal_bias, h) + w["sa_bo"][0]
    x1 = _layernorm(y + sa, w["ln1_g"][0], w["ln1_b"][0])

    # ----- cross-attention over the encoder output (fused KV matmul)
    qx = jnp.dot(x1.astype(jnp.bfloat16), w["ca_wq"][0],
                 preferred_element_type=jnp.float32) + w["ca_bq"][0]
    kv = jnp.dot(enc_bf, w["ca_wkv"][0],
                 preferred_element_type=jnp.float32) + w["ca_bkv"][0]
    ca = _attend(qx, kv[:, :d], kv[:, d:], w["ca_wo"][0], None, h) + w["ca_bo"][0]
    x2 = _layernorm(x1 + ca, w["ln2_g"][0], w["ln2_b"][0])

    # ----- position-wise feed-forward
    hid = jnp.maximum(
        jnp.dot(x2.astype(jnp.bfloat16), w["ff_w1"][0],
                preferred_element_type=jnp.float32) + w["ff_b1"][0], 0.0)
    ff = jnp.dot(hid.astype(jnp.bfloat16), w["ff_w2"][0],
                 preferred_element_type=jnp.float32) + w["ff_b2"][0]
    x3 = _layernorm(x2 + ff, w["ln3_g"][0], w["ln3_b"][0])

    y_scr[...] = x3

    @pl.when(layer == pl.num_programs(1) - 1)
    def _():
        out_ref[0] = x3


def _pack_layer_weights(layer_params, d_model, num_heads):
    """Stack per-layer weights on a leading 'layer' axis.

    - matmul weights cast to bf16 (f32 accumulation in-kernel);
    - Q/K/V fused into one (D, 3D) weight (K/V fused to (D, 2D) for cross-attn);
    - 1/sqrt(dh) softmax scale folded into the Q projections;
    - output projections pre-reshaped to (H, dh, D) so the kernel addresses a
      head with a free leading index (no head merge / transposes).
    """
    dh = d_model // num_heads
    scale = 1.0 / math.sqrt(dh)
    bf16, f32 = jnp.bfloat16, jnp.float32

    def stack(fn, dtype):
        return jnp.stack([fn(p) for p in layer_params], axis=0).astype(dtype)

    return {
        "sa_wqkv": stack(lambda p: jnp.concatenate(
            [p["sa_wq"] * scale, p["sa_wk"], p["sa_wv"]], axis=1), bf16),
        "sa_bqkv": stack(lambda p: jnp.concatenate(
            [p["sa_bq"] * scale, p["sa_bk"], p["sa_bv"]])[None, :], f32),
        "sa_wo": stack(lambda p: p["sa_wo"].reshape(num_heads, dh, d_model), bf16),
        "sa_bo": stack(lambda p: p["sa_bo"][None, :], f32),
        "ln1_g": stack(lambda p: p["ln1_g"][None, :], f32),
        "ln1_b": stack(lambda p: p["ln1_b"][None, :], f32),
        "ca_wq": stack(lambda p: p["ca_wq"] * scale, bf16),
        "ca_bq": stack(lambda p: (p["ca_bq"] * scale)[None, :], f32),
        "ca_wkv": stack(lambda p: jnp.concatenate(
            [p["ca_wk"], p["ca_wv"]], axis=1), bf16),
        "ca_bkv": stack(lambda p: jnp.concatenate(
            [p["ca_bk"], p["ca_bv"]])[None, :], f32),
        "ca_wo": stack(lambda p: p["ca_wo"].reshape(num_heads, dh, d_model), bf16),
        "ca_bo": stack(lambda p: p["ca_bo"][None, :], f32),
        "ln2_g": stack(lambda p: p["ln2_g"][None, :], f32),
        "ln2_b": stack(lambda p: p["ln2_b"][None, :], f32),
        "ff_w1": stack(lambda p: p["ff_w1"], bf16),
        "ff_b1": stack(lambda p: p["ff_b1"][None, :], f32),
        "ff_w2": stack(lambda p: p["ff_w2"], bf16),
        "ff_b2": stack(lambda p: p["ff_b2"][None, :], f32),
        "ln3_g": stack(lambda p: p["ln3_g"][None, :], f32),
        "ln3_b": stack(lambda p: p["ln3_b"][None, :], f32),
    }


def decoder_stack_pallas(y, enc, layer_params, num_heads):
    """Run the full decoder stack in ONE fused pallas_call. y/enc: (B, S, D) f32."""
    B, S, D = y.shape
    S_enc = enc.shape[1]
    num_layers = len(layer_params)
    d_ff = int(layer_params[0]["ff_w1"].shape[1])

    packed = _pack_layer_weights(layer_params, D, num_heads)
    weights = [packed[k] for k in _STACKED_KEYS]

    def per_layer_spec(arr):
        nd = arr.ndim
        return pl.BlockSpec((1,) + arr.shape[1:],
                            lambda b, l, nd=nd: (l,) + (0,) * (nd - 1))

    in_specs = ([pl.BlockSpec((1, S, D), lambda b, l: (b, 0, 0)),
                 pl.BlockSpec((1, S_enc, D), lambda b, l: (b, 0, 0))]
                + [per_layer_spec(wt) for wt in weights])
    out_spec = pl.BlockSpec((1, S, D), lambda b, l: (b, 0, 0))

    # Explicit scoped-VMEM budget: double-buffered per-layer weights + activation
    # blocks + scratch + live intermediates + headroom (the default 16/32 MiB
    # scoped limit is too small at production d_model/d_ff).
    per_layer_w_bytes = sum(
        int(np.prod(wt.shape[1:])) * wt.dtype.itemsize for wt in weights)
    act_bytes = 2 * (2 * S * D + S_enc * D) * 4
    work_bytes = (3 * S * D + 2 * S_enc * D + S * max(S, S_enc)
                  + 2 * S * d_ff + 4 * S * D) * 4
    vmem_limit = int(min(100 * 1024 * 1024,          # v7x physical cap is 64 MiB/TC
                         max(32 * 1024 * 1024,
                             2 * per_layer_w_bytes + act_bytes + work_bytes
                             + 4 * 1024 * 1024)))

    # Advisory cost estimate for the XLA scheduler around the fused call.
    per_layer_flops = (
        2 * S * D * 3 * D + 2 * S * D * D            # self qkv + out proj
        + 4 * S * S * D                              # self QK^T + PV
        + 2 * S * D * D + 2 * S_enc * D * 2 * D      # cross q + kv proj
        + 4 * S * S_enc * D + 2 * S * D * D          # cross attn + out proj
        + 4 * S * D * d_ff)                          # FFN
    flops = B * num_layers * per_layer_flops
    transcendentals = B * num_layers * (num_heads * (S * S + S * S_enc) + 6 * S)
    bytes_accessed = (B * num_layers * per_layer_w_bytes
                      + (2 * B * S * D + B * S_enc * D) * 4)

    return pl.pallas_call(
        functools.partial(_decoder_stack_kernel, num_heads),
        out_shape=jax.ShapeDtypeStruct((B, S, D), jnp.float32),
        grid=(B, num_layers),
        in_specs=in_specs,
        out_specs=out_spec,
        scratch_shapes=[pltpu.VMEM((S, D), jnp.float32)],
        compiler_params=pltpu.CompilerParams(
            dimension_semantics=("parallel", "arbitrary"),
            vmem_limit_bytes=vmem_limit),
        cost_estimate=pl.CostEstimate(
            flops=int(flops), transcendentals=int(transcendentals),
            bytes_accessed=int(bytes_accessed)),
    )(y, enc, *weights)


# ----------------------------------------------------------------------------
# Parameter init (deterministic) + positional embedding glue.
# ----------------------------------------------------------------------------
def _sinusoidal_pe(seq_len, d_model):
    pos = np.arange(seq_len, dtype=np.float32)[:, None]
    i = np.arange(d_model, dtype=np.float32)[None, :]
    angle = pos / np.power(10000.0, (2.0 * np.floor(i / 2.0)) / d_model)
    pe = np.zeros((seq_len, d_model), dtype=np.float32)
    pe[:, 0::2] = np.sin(angle[:, 0::2])
    pe[:, 1::2] = np.cos(angle[:, 1::2])
    return jnp.asarray(pe)


def init_params(key, vocab_size, d_model, d_ff, num_decoders):
    keys = jax.random.split(key, 1 + num_decoders)
    params = {"embedding": jax.random.normal(keys[0], (vocab_size, d_model),
                                             jnp.float32) * 0.02}
    layers = []
    for li in range(num_decoders):
        lk = jax.random.split(keys[1 + li], 16)
        it = iter(lk)
        p = {}
        for prefix in ("sa", "ca"):
            for name in ("wq", "wk", "wv", "wo"):
                p[f"{prefix}_{name}"] = jax.random.normal(
                    next(it), (d_model, d_model), jnp.float32) * 0.02
            for name in ("bq", "bk", "bv", "bo"):
                p[f"{prefix}_{name}"] = jnp.zeros((d_model,), jnp.float32)
        p["ff_w1"] = jax.random.normal(next(it), (d_model, d_ff), jnp.float32) * 0.02
        p["ff_b1"] = jnp.zeros((d_ff,), jnp.float32)
        p["ff_w2"] = jax.random.normal(next(it), (d_ff, d_model), jnp.float32) * 0.02
        p["ff_b2"] = jnp.zeros((d_model,), jnp.float32)
        for ln in ("ln1", "ln2", "ln3"):
            p[f"{ln}_g"] = jnp.ones((d_model,), jnp.float32)
            p[f"{ln}_b"] = jnp.zeros((d_model,), jnp.float32)
        layers.append(p)
    params["layers"] = layers
    return params


def decoder_forward_pallas(token_ids, encoder_output, params, d_model, num_heads):
    S = token_ids.shape[1]
    emb = params["embedding"][token_ids] * math.sqrt(d_model)   # glue: gather in JAX
    y = emb + _sinusoidal_pe(S, d_model)[None, :, :]
    # dropout: identity (eval mode)
    return decoder_stack_pallas(y, encoder_output, params["layers"], num_heads)


def decoder_forward_ref(token_ids, encoder_output, params, d_model, num_heads):
    S = token_ids.shape[1]
    emb = params["embedding"][token_ids] * math.sqrt(d_model)
    y = emb + _sinusoidal_pe(S, d_model)[None, :, :]
    for layer_p in params["layers"]:
        y = jax.vmap(lambda yb, eb: _decoder_layer_ref(yb, eb, layer_p, num_heads))(
            y, encoder_output)
    return y


# ----------------------------------------------------------------------------
if __name__ == "__main__":
    vocab_size = 50
    d_model = 32
    num_heads = 4
    d_ff = 64
    num_decoders = 2
    seq_len = 8
    batch = 2

    root = jax.random.PRNGKey(0)
    k_tok, k_enc, k_par = jax.random.split(root, 3)

    token_ids = jax.random.randint(k_tok, (batch, seq_len), 0, vocab_size,
                                   dtype=jnp.int32)
    encoder_output = jax.random.normal(k_enc, (batch, seq_len, d_model), jnp.float32)
    params = init_params(k_par, vocab_size, d_model, d_ff, num_decoders)

    out = decoder_forward_pallas(token_ids, encoder_output, params, d_model, num_heads)
    out = jax.block_until_ready(out)

    ref = decoder_forward_ref(token_ids, encoder_output, params, d_model, num_heads)
    ref = jax.block_until_ready(ref)

    # bf16 matmul operands (f32 accumulation) vs. the all-f32 reference.
    np.testing.assert_allclose(np.asarray(out), np.asarray(ref), rtol=3e-2, atol=3e-2)
    print("KERNEL_OK")
</pallas_src>

<mosaic_0001>
module attributes {stable_mosaic.version = 11 : i64} {
  func.func @_decoder_stack_kernel(%arg0: i32, %arg1: i32, %arg2: memref<1x8x32xf32, #tpu.memory_space<vmem>>, %arg3: memref<1x8x32xf32, #tpu.memory_space<vmem>>, %arg4: memref<1x32x96xbf16, #tpu.memory_space<vmem>>, %arg5: memref<1x1x96xf32, #tpu.memory_space<vmem>>, %arg6: memref<1x4x8x32xbf16, #tpu.memory_space<vmem>>, %arg7: memref<1x1x32xf32, #tpu.memory_space<vmem>>, %arg8: memref<1x1x32xf32, #tpu.memory_space<vmem>>, %arg9: memref<1x1x32xf32, #tpu.memory_space<vmem>>, %arg10: memref<1x32x32xbf16, #tpu.memory_space<vmem>>, %arg11: memref<1x1x32xf32, #tpu.memory_space<vmem>>, %arg12: memref<1x32x64xbf16, #tpu.memory_space<vmem>>, %arg13: memref<1x1x64xf32, #tpu.memory_space<vmem>>, %arg14: memref<1x4x8x32xbf16, #tpu.memory_space<vmem>>, %arg15: memref<1x1x32xf32, #tpu.memory_space<vmem>>, %arg16: memref<1x1x32xf32, #tpu.memory_space<vmem>>, %arg17: memref<1x1x32xf32, #tpu.memory_space<vmem>>, %arg18: memref<1x32x64xbf16, #tpu.memory_space<vmem>>, %arg19: memref<1x1x64xf32, #tpu.memory_space<vmem>>, %arg20: memref<1x64x32xbf16, #tpu.memory_space<vmem>>, %arg21: memref<1x1x32xf32, #tpu.memory_space<vmem>>, %arg22: memref<1x1x32xf32, #tpu.memory_space<vmem>>, %arg23: memref<1x1x32xf32, #tpu.memory_space<vmem>>, %arg24: memref<1x8x32xf32, #tpu.memory_space<vmem>>, %arg25: memref<8x32xf32, #tpu.memory_space<vmem>>) attributes {dimension_semantics = [#tpu.dimension_semantics<parallel>, #tpu.dimension_semantics<arbitrary>], iteration_bounds = array<i64: 2, 2>, scalar_prefetch = 0 : i64, scratch_operands = 1 : i64, tpu.core_type = #tpu.core_type<tc>, window_params = [{transform_indices = @transform_0, window_bounds = array<i64: 1, 8, 32>}, {transform_indices = @transform_1, window_bounds = array<i64: 1, 8, 32>}, {transform_indices = @transform_2, window_bounds = array<i64: 1, 32, 96>}, {transform_indices = @transform_3, window_bounds = array<i64: 1, 1, 96>}, {transform_indices = @transform_4, window_bounds = array<i64: 1, 4, 8, 32>}, {transform_indices = @transform_5, window_bounds = array<i64: 1, 1, 32>}, {transform_indices = @transform_6, window_bounds = array<i64: 1, 1, 32>}, {transform_indices = @transform_7, window_bounds = array<i64: 1, 1, 32>}, {transform_indices = @transform_8, window_bounds = array<i64: 1, 32, 32>}, {transform_indices = @transform_9, window_bounds = array<i64: 1, 1, 32>}, {transform_indices = @transform_10, window_bounds = array<i64: 1, 32, 64>}, {transform_indices = @transform_11, window_bounds = array<i64: 1, 1, 64>}, {transform_indices = @transform_12, window_bounds = array<i64: 1, 4, 8, 32>}, {transform_indices = @transform_13, window_bounds = array<i64: 1, 1, 32>}, {transform_indices = @transform_14, window_bounds = array<i64: 1, 1, 32>}, {transform_indices = @transform_15, window_bounds = array<i64: 1, 1, 32>}, {transform_indices = @transform_16, window_bounds = array<i64: 1, 32, 64>}, {transform_indices = @transform_17, window_bounds = array<i64: 1, 1, 64>}, {transform_indices = @transform_18, window_bounds = array<i64: 1, 64, 32>}, {transform_indices = @transform_19, window_bounds = array<i64: 1, 1, 32>}, {transform_indices = @transform_20, window_bounds = array<i64: 1, 1, 32>}, {transform_indices = @transform_21, window_bounds = array<i64: 1, 1, 32>}, {transform_indices = @transform_22, window_bounds = array<i64: 1, 8, 32>}]} {
    %c0_i32 = arith.constant 0 : i32
    %0 = arith.cmpi eq, %arg1, %c0_i32 : i32
    %1 = arith.extui %0 : i1 to i32
    %c0_i32_0 = arith.constant 0 : i32
    %2 = arith.cmpi ne, %1, %c0_i32_0 : i32
    scf.if %2 {
      %c0_132 = arith.constant 0 : index
      %c0_133 = arith.constant 0 : index
      %c0_134 = arith.constant 0 : index
      %332 = vector.load %arg2[%c0_132, %c0_133, %c0_134] : memref<1x8x32xf32, #tpu.memory_space<vmem>>, vector<1x8x32xf32>
      %333 = vector.shape_cast %332 : vector<1x8x32xf32> to vector<8x32xf32>
      %c0_135 = arith.constant 0 : index
      %c0_136 = arith.constant 0 : index
      %334 = vector.load %arg25[%c0_135, %c0_136] : memref<8x32xf32, #tpu.memory_space<vmem>>, vector<8x32xf32>
      tpu.vector_store %arg25[%c0_135, %c0_136], %333 {strides = array<i32>} : memref<8x32xf32, #tpu.memory_space<vmem>>, vector<8x32xf32>,
    } else {
    }
    %c0 = arith.constant 0 : index
    %c0_1 = arith.constant 0 : index
    %3 = vector.load %arg25[%c0, %c0_1] : memref<8x32xf32, #tpu.memory_space<vmem>>, vector<8x32xf32>
    %c0_2 = arith.constant 0 : index
    %c0_3 = arith.constant 0 : index
    %c0_4 = arith.constant 0 : index
    %4 = vector.load %arg3[%c0_2, %c0_3, %c0_4] : memref<1x8x32xf32, #tpu.memory_space<vmem>>, vector<1x8x32xf32>
    %5 = vector.shape_cast %4 : vector<1x8x32xf32> to vector<8x32xf32>
    %6 = arith.truncf %5 : vector<8x32xf32> to vector<8x32xbf16>
    %7 = tpu.iota {dimensions = array<i32: 0>} : vector<8x8xi32>
    %8 = tpu.iota {dimensions = array<i32: 1>} : vector<8x8xi32>
    %9 = arith.cmpi sle, %8, %7 : vector<8x8xi32>
    %cst = arith.constant 0.000000e+00 : f32
    %cst_5 = arith.constant -1.000000e+30 : f32
    %10 = vector.broadcast %cst : f32 to vector<8x8xf32>
    %11 = vector.broadcast %cst_5 : f32 to vector<8x8xf32>
    %12 = arith.select %9, %10, %11 : vector<8x8xi1>, vector<8x8xf32>
    %13 = arith.truncf %3 : vector<8x32xf32> to vector<8x32xbf16>
    %c0_6 = arith.constant 0 : index
    %c0_7 = arith.constant 0 : index
    %c0_8 = arith.constant 0 : index
    %14 = vector.load %arg4[%c0_6, %c0_7, %c0_8] : memref<1x32x96xbf16, #tpu.memory_space<vmem>>, vector<1x32x96xbf16>
    %15 = vector.shape_cast %14 : vector<1x32x96xbf16> to vector<32x96xbf16>
    %cst_9 = arith.constant dense<0.000000e+00> : vector<8x96xf32>
    %16 = tpu.matmul %13, %15, %cst_9 {dimension_numbers = #tpu.dot_dimension_numbers<[1], [0], [0], [1], [0, 0, 1, 1], [], []>} : vector<8x32xbf16>, vector<32x96xbf16>, vector<8x96xf32> -> vector<8x96xf32>
    %c0_10 = arith.constant 0 : index
    %c0_11 = arith.constant 0 : index
    %c0_12 = arith.constant 0 : index
    %17 = vector.load %arg5[%c0_10, %c0_11, %c0_12] : memref<1x1x96xf32, #tpu.memory_space<vmem>>, vector<1x1x96xf32>
    %18 = vector.shape_cast %17 : vector<1x1x96xf32> to vector<1x96xf32>
    %19 = vector.broadcast %18 : vector<1x96xf32> to vector<8x96xf32>
    %20 = arith.addf %16, %19 : vector<8x96xf32>
    %21 = vector.extract_strided_slice %20 {offsets = [0, 0], sizes = [8, 32], strides = [1, 1]} : vector<8x96xf32> to vector<8x32xf32>
    %22 = vector.extract_strided_slice %20 {offsets = [0, 32], sizes = [8, 32], strides = [1, 1]} : vector<8x96xf32> to vector<8x32xf32>
    %23 = vector.extract_strided_slice %20 {offsets = [0, 64], sizes = [8, 32], strides = [1, 1]} : vector<8x96xf32> to vector<8x32xf32>
    %c0_13 = arith.constant 0 : index
    %c0_14 = arith.constant 0 : index
    %c0_15 = arith.constant 0 : index
    %c0_16 = arith.constant 0 : index
    %24 = vector.load %arg6[%c0_13, %c0_14, %c0_15, %c0_16] : memref<1x4x8x32xbf16, #tpu.memory_space<vmem>>, vector<1x4x8x32xbf16>
    %25 = vector.shape_cast %24 : vector<1x4x8x32xbf16> to vector<4x8x32xbf16>
    %26 = arith.truncf %21 : vector<8x32xf32> to vector<8x32xbf16>
    %27 = arith.truncf %22 : vector<8x32xf32> to vector<8x32xbf16>
    %28 = arith.truncf %23 : vector<8x32xf32> to vector<8x32xbf16>
    %29 = vector.extract_strided_slice %26 {offsets = [0, 0], sizes = [8, 8], strides = [1, 1]} : vector<8x32xbf16> to vector<8x8xbf16>
    %30 = vector.extract_strided_slice %27 {offsets = [0, 0], sizes = [8, 8], strides = [1, 1]} : vector<8x32xbf16> to vector<8x8xbf16>
    %cst_17 = arith.constant dense<0.000000e+00> : vector<8x8xf32>
    %31 = tpu.matmul %29, %30, %cst_17 {dimension_numbers = #tpu.dot_dimension_numbers<[1], [1], [0], [0], [0, 0, 1, 0], [], []>} : vector<8x8xbf16>, vector<8x8xbf16>, vector<8x8xf32> -> vector<8x8xf32>
    %32 = arith.addf %31, %12 : vector<8x8xf32>
    %cst_18 = arith.constant dense<0xFF800000> : vector<8xf32>
    %33 = vector.multi_reduction <maximumf>, %32, %cst_18 [1] : vector<8x8xf32> to vector<8xf32>
    %34 = vector.shape_cast %33 : vector<8xf32> to vector<8x1xf32>
    %35 = vector.broadcast %34 : vector<8x1xf32> to vector<8x8xf32>
    %36 = arith.subf %32, %35 : vector<8x8xf32>
    %37 = math.exp %36 : vector<8x8xf32>
    %cst_19 = arith.constant dense<0.000000e+00> : vector<8xf32>
    %38 = vector.multi_reduction <add>, %37, %cst_19 [1] : vector<8x8xf32> to vector<8xf32>
    %39 = vector.shape_cast %38 : vector<8xf32> to vector<8x1xf32>
    %40 = tpu.reciprocal %39 {approx = true} : vector<8x1xf32> -> vector<8x1xf32>
    %41 = vector.broadcast %40 : vector<8x1xf32> to vector<8x8xf32>
    %42 = arith.mulf %37, %41 : vector<8x8xf32>
    %43 = arith.truncf %42 : vector<8x8xf32> to vector<8x8xbf16>
    %44 = vector.extract_strided_slice %28 {offsets = [0, 0], sizes = [8, 8], strides = [1, 1]} : vector<8x32xbf16> to vector<8x8xbf16>
    %cst_20 = arith.constant dense<0.000000e+00> : vector<8x8xf32>
    %45 = tpu.matmul %43, %44, %cst_20 {dimension_numbers = #tpu.dot_dimension_numbers<[1], [0], [0], [1], [0, 0, 1, 1], [], []>} : vector<8x8xbf16>, vector<8x8xbf16>, vector<8x8xf32> -> vector<8x8xf32>
    %46 = arith.truncf %45 : vector<8x8xf32> to vector<8x8xbf16>
    %47 = vector.extract_strided_slice %25 {offsets = [0, 0, 0], sizes = [1, 8, 32], strides = [1, 1, 1]} : vector<4x8x32xbf16> to vector<1x8x32xbf16>
    %48 = vector.shape_cast %47 : vector<1x8x32xbf16> to vector<8x32xbf16>
    %cst_21 = arith.constant dense<0.000000e+00> : vector<8x32xf32>
    %49 = tpu.matmul %46, %48, %cst_21 {dimension_numbers = #tpu.dot_dimension_numbers<[1], [0], [0], [1], [0, 0, 1, 1], [], []>} : vector<8x8xbf16>, vector<8x32xbf16>, vector<8x32xf32> -> vector<8x32xf32>
    %50 = vector.extract_strided_slice %26 {offsets = [0, 8], sizes = [8, 8], strides = [1, 1]} : vector<8x32xbf16> to vector<8x8xbf16>
    %51 = vector.extract_strided_slice %27 {offsets = [0, 8], sizes = [8, 8], strides = [1, 1]} : vector<8x32xbf16> to vector<8x8xbf16>
    %cst_22 = arith.constant dense<0.000000e+00> : vector<8x8xf32>
    %52 = tpu.matmul %50, %51, %cst_22 {dimension_numbers = #tpu.dot_dimension_numbers<[1], [1], [0], [0], [0, 0, 1, 0], [], []>} : vector<8x8xbf16>, vector<8x8xbf16>, vector<8x8xf32> -> vector<8x8xf32>
    %53 = arith.addf %52, %12 : vector<8x8xf32>
    %cst_23 = arith.constant dense<0xFF800000> : vector<8xf32>
    %54 = vector.multi_reduction <maximumf>, %53, %cst_23 [1] : vector<8x8xf32> to vector<8xf32>
    %55 = vector.shape_cast %54 : vector<8xf32> to vector<8x1xf32>
    %56 = vector.broadcast %55 : vector<8x1xf32> to vector<8x8xf32>
    %57 = arith.subf %53, %56 : vector<8x8xf32>
    %58 = math.exp %57 : vector<8x8xf32>
    %cst_24 = arith.constant dense<0.000000e+00> : vector<8xf32>
    %59 = vector.multi_reduction <add>, %58, %cst_24 [1] : vector<8x8xf32> to vector<8xf32>
    %60 = vector.shape_cast %59 : vector<8xf32> to vector<8x1xf32>
    %61 = tpu.reciprocal %60 {approx = true} : vector<8x1xf32> -> vector<8x1xf32>
    %62 = vector.broadcast %61 : vector<8x1xf32> to vector<8x8xf32>
    %63 = arith.mulf %58, %62 : vector<8x8xf32>
    %64 = arith.truncf %63 : vector<8x8xf32> to vector<8x8xbf16>
    %65 = vector.extract_strided_slice %28 {offsets = [0, 8], sizes = [8, 8], strides = [1, 1]} : vector<8x32xbf16> to vector<8x8xbf16>
    %cst_25 = arith.constant dense<0.000000e+00> : vector<8x8xf32>
    %66 = tpu.matmul %64, %65, %cst_25 {dimension_numbers = #tpu.dot_dimension_numbers<[1], [0], [0], [1], [0, 0, 1, 1], [], []>} : vector<8x8xbf16>, vector<8x8xbf16>, vector<8x8xf32> -> vector<8x8xf32>
    %67 = arith.truncf %66 : vector<8x8xf32> to vector<8x8xbf16>
    %68 = vector.extract_strided_slice %25 {offsets = [1, 0, 0], sizes = [1, 8, 32], strides = [1, 1, 1]} : vector<4x8x32xbf16> to vector<1x8x32xbf16>
    %69 = vector.shape_cast %68 : vector<1x8x32xbf16> to vector<8x32xbf16>
    %cst_26 = arith.constant dense<0.000000e+00> : vector<8x32xf32>
    %70 = tpu.matmul %67, %69, %cst_26 {dimension_numbers = #tpu.dot_dimension_numbers<[1], [0], [0], [1], [0, 0, 1, 1], [], []>} : vector<8x8xbf16>, vector<8x32xbf16>, vector<8x32xf32> -> vector<8x32xf32>
    %71 = arith.addf %49, %70 : vector<8x32xf32>
    %72 = vector.extract_strided_slice %26 {offsets = [0, 16], sizes = [8, 8], strides = [1, 1]} : vector<8x32xbf16> to vector<8x8xbf16>
    %73 = vector.extract_strided_slice %27 {offsets = [0, 16], sizes = [8, 8], strides = [1, 1]} : vector<8x32xbf16> to vector<8x8xbf16>
    %cst_27 = arith.constant dense<0.000000e+00> : vector<8x8xf32>
    %74 = tpu.matmul %72, %73, %cst_27 {dimension_numbers = #tpu.dot_dimension_numbers<[1], [1], [0], [0], [0, 0, 1, 0], [], []>} : vector<8x8xbf16>, vector<8x8xbf16>, vector<8x8xf32> -> vector<8x8xf32>
    %75 = arith.addf %74, %12 : vector<8x8xf32>
    %cst_28 = arith.constant dense<0xFF800000> : vector<8xf32>
    %76 = vector.multi_reduction <maximumf>, %75, %cst_28 [1] : vector<8x8xf32> to vector<8xf32>
    %77 = vector.shape_cast %76 : vector<8xf32> to vector<8x1xf32>
    %78 = vector.broadcast %77 : vector<8x1xf32> to vector<8x8xf32>
    %79 = arith.subf %75, %78 : vector<8x8xf32>
    %80 = math.exp %79 : vector<8x8xf32>
    %cst_29 = arith.constant dense<0.000000e+00> : vector<8xf32>
    %81 = vector.multi_reduction <add>, %80, %cst_29 [1] : vector<8x8xf32> to vector<8xf32>
    %82 = vector.shape_cast %81 : vector<8xf32> to vector<8x1xf32>
    %83 = tpu.reciprocal %82 {approx = true} : vector<8x1xf32> -> vector<8x1xf32>
    %84 = vector.broadcast %83 : vector<8x1xf32> to vector<8x8xf32>
    %85 = arith.mulf %80, %84 : vector<8x8xf32>
    %86 = arith.truncf %85 : vector<8x8xf32> to vector<8x8xbf16>
    %87 = vector.extract_strided_slice %28 {offsets = [0, 16], sizes = [8, 8], strides = [1, 1]} : vector<8x32xbf16> to vector<8x8xbf16>
    %cst_30 = arith.constant dense<0.000000e+00> : vector<8x8xf32>
    %88 = tpu.matmul %86, %87, %cst_30 {dimension_numbers = #tpu.dot_dimension_numbers<[1], [0], [0], [1], [0, 0, 1, 1], [], []>} : vector<8x8xbf16>, vector<8x8xbf16>, vector<8x8xf32> -> vector<8x8xf32>
    %89 = arith.truncf %88 : vector<8x8xf32> to vector<8x8xbf16>
    %90 = vector.extract_strided_slice %25 {offsets = [2, 0, 0], sizes = [1, 8, 32], strides = [1, 1, 1]} : vector<4x8x32xbf16> to vector<1x8x32xbf16>
    %91 = vector.shape_cast %90 : vector<1x8x32xbf16> to vector<8x32xbf16>
    %cst_31 = arith.constant dense<0.000000e+00> : vector<8x32xf32>
    %92 = tpu.matmul %89, %91, %cst_31 {dimension_numbers = #tpu.dot_dimension_numbers<[1], [0], [0], [1], [0, 0, 1, 1], [], []>} : vector<8x8xbf16>, vector<8x32xbf16>, vector<8x32xf32> -> vector<8x32xf32>
    %93 = arith.addf %71, %92 : vector<8x32xf32>
    %94 = vector.extract_strided_slice %26 {offsets = [0, 24], sizes = [8, 8], strides = [1, 1]} : vector<8x32xbf16> to vector<8x8xbf16>
    %95 = vector.extract_strided_slice %27 {offsets = [0, 24], sizes = [8, 8], strides = [1, 1]} : vector<8x32xbf16> to vector<8x8xbf16>
    %cst_32 = arith.constant dense<0.000000e+00> : vector<8x8xf32>
    %96 = tpu.matmul %94, %95, %cst_32 {dimension_numbers = #tpu.dot_dimension_numbers<[1], [1], [0], [0], [0, 0, 1, 0], [], []>} : vector<8x8xbf16>, vector<8x8xbf16>, vector<8x8xf32> -> vector<8x8xf32>
    %97 = arith.addf %96, %12 : vector<8x8xf32>
    %cst_33 = arith.constant dense<0xFF800000> : vector<8xf32>
    %98 = vector.multi_reduction <maximumf>, %97, %cst_33 [1] : vector<8x8xf32> to vector<8xf32>
    %99 = vector.shape_cast %98 : vector<8xf32> to vector<8x1xf32>
    %100 = vector.broadcast %99 : vector<8x1xf32> to vector<8x8xf32>
    %101 = arith.subf %97, %100 : vector<8x8xf32>
    %102 = math.exp %101 : vector<8x8xf32>
    %cst_34 = arith.constant dense<0.000000e+00> : vector<8xf32>
    %103 = vector.multi_reduction <add>, %102, %cst_34 [1] : vector<8x8xf32> to vector<8xf32>
    %104 = vector.shape_cast %103 : vector<8xf32> to vector<8x1xf32>
    %105 = tpu.reciprocal %104 {approx = true} : vector<8x1xf32> -> vector<8x1xf32>
    %106 = vector.broadcast %105 : vector<8x1xf32> to vector<8x8xf32>
    %107 = arith.mulf %102, %106 : vector<8x8xf32>
    %108 = arith.truncf %107 : vector<8x8xf32> to vector<8x8xbf16>
    %109 = vector.extract_strided_slice %28 {offsets = [0, 24], sizes = [8, 8], strides = [1, 1]} : vector<8x32xbf16> to vector<8x8xbf16>
    %cst_35 = arith.constant dense<0.000000e+00> : vector<8x8xf32>
    %110 = tpu.matmul %108, %109, %cst_35 {dimension_numbers = #tpu.dot_dimension_numbers<[1], [0], [0], [1], [0, 0, 1, 1], [], []>} : vector<8x8xbf16>, vector<8x8xbf16>, vector<8x8xf32> -> vector<8x8xf32>
    %111 = arith.truncf %110 : vector<8x8xf32> to vector<8x8xbf16>
    %112 = vector.extract_strided_slice %25 {offsets = [3, 0, 0], sizes = [1, 8, 32], strides = [1, 1, 1]} : vector<4x8x32xbf16> to vector<1x8x32xbf16>
    %113 = vector.shape_cast %112 : vector<1x8x32xbf16> to vector<8x32xbf16>
    %cst_36 = arith.constant dense<0.000000e+00> : vector<8x32xf32>
    %114 = tpu.matmul %111, %113, %cst_36 {dimension_numbers = #tpu.dot_dimension_numbers<[1], [0], [0], [1], [0, 0, 1, 1], [], []>} : vector<8x8xbf16>, vector<8x32xbf16>, vector<8x32xf32> -> vector<8x32xf32>
    %115 = arith.addf %93, %114 : vector<8x32xf32>
    %c0_37 = arith.constant 0 : index
    %c0_38 = arith.constant 0 : index
    %c0_39 = arith.constant 0 : index
    %116 = vector.load %arg7[%c0_37, %c0_38, %c0_39] : memref<1x1x32xf32, #tpu.memory_space<vmem>>, vector<1x1x32xf32>
    %117 = vector.shape_cast %116 : vector<1x1x32xf32> to vector<1x32xf32>
    %118 = vector.broadcast %117 : vector<1x32xf32> to vector<8x32xf32>
    %119 = arith.addf %115, %118 : vector<8x32xf32>
    %120 = arith.addf %3, %119 : vector<8x32xf32>
    %c0_40 = arith.constant 0 : index
    %c0_41 = arith.constant 0 : index
    %c0_42 = arith.constant 0 : index
    %121 = vector.load %arg8[%c0_40, %c0_41, %c0_42] : memref<1x1x32xf32, #tpu.memory_space<vmem>>, vector<1x1x32xf32>
    %122 = vector.shape_cast %121 : vector<1x1x32xf32> to vector<1x32xf32>
    %c0_43 = arith.constant 0 : index
    %c0_44 = arith.constant 0 : index
    %c0_45 = arith.constant 0 : index
    %123 = vector.load %arg9[%c0_43, %c0_44, %c0_45] : memref<1x1x32xf32, #tpu.memory_space<vmem>>, vector<1x1x32xf32>
    %124 = vector.shape_cast %123 : vector<1x1x32xf32> to vector<1x32xf32>
    %cst_46 = arith.constant dense<0.000000e+00> : vector<8xf32>
    %125 = vector.multi_reduction <add>, %120, %cst_46 [1] : vector<8x32xf32> to vector<8xf32>
    %126 = vector.shape_cast %125 : vector<8xf32> to vector<8x1xf32>
    %cst_47 = arith.constant 3.125000e-02 : f32
    %127 = vector.broadcast %cst_47 : f32 to vector<8x1xf32>
    %128 = arith.mulf %126, %127 : vector<8x1xf32>
    %129 = arith.mulf %120, %120 : vector<8x32xf32>
    %cst_48 = arith.constant dense<0.000000e+00> : vector<8xf32>
    %130 = vector.multi_reduction <add>, %129, %cst_48 [1] : vector<8x32xf32> to vector<8xf32>
    %131 = vector.shape_cast %130 : vector<8xf32> to vector<8x1xf32>
    %cst_49 = arith.constant 3.125000e-02 : f32
    %132 = vector.broadcast %cst_49 : f32 to vector<8x1xf32>
    %133 = arith.mulf %131, %132 : vector<8x1xf32>
    %134 = arith.mulf %128, %128 : vector<8x1xf32>
    %135 = arith.subf %133, %134 : vector<8x1xf32>
    %136 = vector.broadcast %128 : vector<8x1xf32> to vector<8x32xf32>
    %137 = arith.subf %120, %136 : vector<8x32xf32>
    %cst_50 = arith.constant 9.99999974E-6 : f32
    %138 = vector.broadcast %cst_50 : f32 to vector<8x1xf32>
    %139 = arith.addf %135, %138 : vector<8x1xf32>
    %140 = math.rsqrt %139 : vector<8x1xf32>
    %141 = vector.broadcast %140 : vector<8x1xf32> to vector<8x32xf32>
    %142 = arith.mulf %137, %141 : vector<8x32xf32>
    %143 = vector.broadcast %122 : vector<1x32xf32> to vector<8x32xf32>
    %144 = arith.mulf %142, %143 : vector<8x32xf32>
    %145 = vector.broadcast %124 : vector<1x32xf32> to vector<8x32xf32>
    %146 = arith.addf %144, %145 : vector<8x32xf32>
    %147 = arith.truncf %146 : vector<8x32xf32> to vector<8x32xbf16>
    %c0_51 = arith.constant 0 : index
    %c0_52 = arith.constant 0 : index
    %c0_53 = arith.constant 0 : index
    %148 = vector.load %arg10[%c0_51, %c0_52, %c0_53] : memref<1x32x32xbf16, #tpu.memory_space<vmem>>, vector<1x32x32xbf16>
    %149 = vector.shape_cast %148 : vector<1x32x32xbf16> to vector<32x32xbf16>
    %cst_54 = arith.constant dense<0.000000e+00> : vector<8x32xf32>
    %150 = tpu.matmul %147, %149, %cst_54 {dimension_numbers = #tpu.dot_dimension_numbers<[1], [0], [0], [1], [0, 0, 1, 1], [], []>} : vector<8x32xbf16>, vector<32x32xbf16>, vector<8x32xf32> -> vector<8x32xf32>
    %c0_55 = arith.constant 0 : index
    %c0_56 = arith.constant 0 : index
    %c0_57 = arith.constant 0 : index
    %151 = vector.load %arg11[%c0_55, %c0_56, %c0_57] : memref<1x1x32xf32, #tpu.memory_space<vmem>>, vector<1x1x32xf32>
    %152 = vector.shape_cast %151 : vector<1x1x32xf32> to vector<1x32xf32>
    %153 = vector.broadcast %152 : vector<1x32xf32> to vector<8x32xf32>
    %154 = arith.addf %150, %153 : vector<8x32xf32>
    %c0_58 = arith.constant 0 : index
    %c0_59 = arith.constant 0 : index
    %c0_60 = arith.constant 0 : index
    %155 = vector.load %arg12[%c0_58, %c0_59, %c0_60] : memref<1x32x64xbf16, #tpu.memory_space<vmem>>, vector<1x32x64xbf16>
    %156 = vector.shape_cast %155 : vector<1x32x64xbf16> to vector<32x64xbf16>
    %cst_61 = arith.constant dense<0.000000e+00> : vector<8x64xf32>
    %157 = tpu.matmul %6, %156, %cst_61 {dimension_numbers = #tpu.dot_dimension_numbers<[1], [0], [0], [1], [0, 0, 1, 1], [], []>} : vector<8x32xbf16>, vector<32x64xbf16>, vector<8x64xf32> -> vector<8x64xf32>
    %c0_62 = arith.constant 0 : index
    %c0_63 = arith.constant 0 : index
    %c0_64 = arith.constant 0 : index
    %158 = vector.load %arg13[%c0_62, %c0_63, %c0_64] : memref<1x1x64xf32, #tpu.memory_space<vmem>>, vector<1x1x64xf32>
    %159 = vector.shape_cast %158 : vector<1x1x64xf32> to vector<1x64xf32>
    %160 = vector.broadcast %159 : vector<1x64xf32> to vector<8x64xf32>
    %161 = arith.addf %157, %160 : vector<8x64xf32>
    %162 = vector.extract_strided_slice %161 {offsets = [0, 0], sizes = [8, 32], strides = [1, 1]} : vector<8x64xf32> to vector<8x32xf32>
    %163 = vector.extract_strided_slice %161 {offsets = [0, 32], sizes = [8, 32], strides = [1, 1]} : vector<8x64xf32> to vector<8x32xf32>
    %c0_65 = arith.constant 0 : index
    %c0_66 = arith.constant 0 : index
    %c0_67 = arith.constant 0 : index
    %c0_68 = arith.constant 0 : index
    %164 = vector.load %arg14[%c0_65, %c0_66, %c0_67, %c0_68] : memref<1x4x8x32xbf16, #tpu.memory_space<vmem>>, vector<1x4x8x32xbf16>
    %165 = vector.shape_cast %164 : vector<1x4x8x32xbf16> to vector<4x8x32xbf16>
    %166 = arith.truncf %154 : vector<8x32xf32> to vector<8x32xbf16>
    %167 = arith.truncf %162 : vector<8x32xf32> to vector<8x32xbf16>
    %168 = arith.truncf %163 : vector<8x32xf32> to vector<8x32xbf16>
    %169 = vector.extract_strided_slice %166 {offsets = [0, 0], sizes = [8, 8], strides = [1, 1]} : vector<8x32xbf16> to vector<8x8xbf16>
    %170 = vector.extract_strided_slice %167 {offsets = [0, 0], sizes = [8, 8], strides = [1, 1]} : vector<8x32xbf16> to vector<8x8xbf16>
    %cst_69 = arith.constant dense<0.000000e+00> : vector<8x8xf32>
    %171 = tpu.matmul %169, %170, %cst_69 {dimension_numbers = #tpu.dot_dimension_numbers<[1], [1], [0], [0], [0, 0, 1, 0], [], []>} : vector<8x8xbf16>, vector<8x8xbf16>, vector<8x8xf32> -> vector<8x8xf32>
    %cst_70 = arith.constant dense<0xFF800000> : vector<8xf32>
    %172 = vector.multi_reduction <maximumf>, %171, %cst_70 [1] : vector<8x8xf32> to vector<8xf32>
    %173 = vector.shape_cast %172 : vector<8xf32> to vector<8x1xf32>
    %174 = vector.broadcast %173 : vector<8x1xf32> to vector<8x8xf32>
    %175 = arith.subf %171, %174 : vector<8x8xf32>
    %176 = math.exp %175 : vector<8x8xf32>
    %cst_71 = arith.constant dense<0.000000e+00> : vector<8xf32>
    %177 = vector.multi_reduction <add>, %176, %cst_71 [1] : vector<8x8xf32> to vector<8xf32>
    %178 = vector.shape_cast %177 : vector<8xf32> to vector<8x1xf32>
    %179 = tpu.reciprocal %178 {approx = true} : vector<8x1xf32> -> vector<8x1xf32>
    %180 = vector.broadcast %179 : vector<8x1xf32> to vector<8x8xf32>
    %181 = arith.mulf %176, %180 : vector<8x8xf32>
    %182 = arith.truncf %181 : vector<8x8xf32> to vector<8x8xbf16>
    %183 = vector.extract_strided_slice %168 {offsets = [0, 0], sizes = [8, 8], strides = [1, 1]} : vector<8x32xbf16> to vector<8x8xbf16>
    %cst_72 = arith.constant dense<0.000000e+00> : vector<8x8xf32>
    %184 = tpu.matmul %182, %183, %cst_72 {dimension_numbers = #tpu.dot_dimension_numbers<[1], [0], [0], [1], [0, 0, 1, 1], [], []>} : vector<8x8xbf16>, vector<8x8xbf16>, vector<8x8xf32> -> vector<8x8xf32>
    %185 = arith.truncf %184 : vector<8x8xf32> to vector<8x8xbf16>
    %186 = vector.extract_strided_slice %165 {offsets = [0, 0, 0], sizes = [1, 8, 32], strides = [1, 1, 1]} : vector<4x8x32xbf16> to vector<1x8x32xbf16>
    %187 = vector.shape_cast %186 : vector<1x8x32xbf16> to vector<8x32xbf16>
    %cst_73 = arith.constant dense<0.000000e+00> : vector<8x32xf32>
    %188 = tpu.matmul %185, %187, %cst_73 {dimension_numbers = #tpu.dot_dimension_numbers<[1], [0], [0], [1], [0, 0, 1, 1], [], []>} : vector<8x8xbf16>, vector<8x32xbf16>, vector<8x32xf32> -> vector<8x32xf32>
    %189 = vector.extract_strided_slice %166 {offsets = [0, 8], sizes = [8, 8], strides = [1, 1]} : vector<8x32xbf16> to vector<8x8xbf16>
    %190 = vector.extract_strided_slice %167 {offsets = [0, 8], sizes = [8, 8], strides = [1, 1]} : vector<8x32xbf16> to vector<8x8xbf16>
    %cst_74 = arith.constant dense<0.000000e+00> : vector<8x8xf32>
    %191 = tpu.matmul %189, %190, %cst_74 {dimension_numbers = #tpu.dot_dimension_numbers<[1], [1], [0], [0], [0, 0, 1, 0], [], []>} : vector<8x8xbf16>, vector<8x8xbf16>, vector<8x8xf32> -> vector<8x8xf32>
    %cst_75 = arith.constant dense<0xFF800000> : vector<8xf32>
    %192 = vector.multi_reduction <maximumf>, %191, %cst_75 [1] : vector<8x8xf32> to vector<8xf32>
    %193 = vector.shape_cast %192 : vector<8xf32> to vector<8x1xf32>
    %194 = vector.broadcast %193 : vector<8x1xf32> to vector<8x8xf32>
    %195 = arith.subf %191, %194 : vector<8x8xf32>
    %196 = math.exp %195 : vector<8x8xf32>
    %cst_76 = arith.constant dense<0.000000e+00> : vector<8xf32>
    %197 = vector.multi_reduction <add>, %196, %cst_76 [1] : vector<8x8xf32> to vector<8xf32>
    %198 = vector.shape_cast %197 : vector<8xf32> to vector<8x1xf32>
    %199 = tpu.reciprocal %198 {approx = true} : vector<8x1xf32> -> vector<8x1xf32>
    %200 = vector.broadcast %199 : vector<8x1xf32> to vector<8x8xf32>
    %201 = arith.mulf %196, %200 : vector<8x8xf32>
    %202 = arith.truncf %201 : vector<8x8xf32> to vector<8x8xbf16>
    %203 = vector.extract_strided_slice %168 {offsets = [0, 8], sizes = [8, 8], strides = [1, 1]} : vector<8x32xbf16> to vector<8x8xbf16>
    %cst_77 = arith.constant dense<0.000000e+00> : vector<8x8xf32>
    %204 = tpu.matmul %202, %203, %cst_77 {dimension_numbers = #tpu.dot_dimension_numbers<[1], [0], [0], [1], [0, 0, 1, 1], [], []>} : vector<8x8xbf16>, vector<8x8xbf16>, vector<8x8xf32> -> vector<8x8xf32>
    %205 = arith.truncf %204 : vector<8x8xf32> to vector<8x8xbf16>
    %206 = vector.extract_strided_slice %165 {offsets = [1, 0, 0], sizes = [1, 8, 32], strides = [1, 1, 1]} : vector<4x8x32xbf16> to vector<1x8x32xbf16>
    %207 = vector.shape_cast %206 : vector<1x8x32xbf16> to vector<8x32xbf16>
    %cst_78 = arith.constant dense<0.000000e+00> : vector<8x32xf32>
    %208 = tpu.matmul %205, %207, %cst_78 {dimension_numbers = #tpu.dot_dimension_numbers<[1], [0], [0], [1], [0, 0, 1, 1], [], []>} : vector<8x8xbf16>, vector<8x32xbf16>, vector<8x32xf32> -> vector<8x32xf32>
    %209 = arith.addf %188, %208 : vector<8x32xf32>
    %210 = vector.extract_strided_slice %166 {offsets = [0, 16], sizes = [8, 8], strides = [1, 1]} : vector<8x32xbf16> to vector<8x8xbf16>
    %211 = vector.extract_strided_slice %167 {offsets = [0, 16], sizes = [8, 8], strides = [1, 1]} : vector<8x32xbf16> to vector<8x8xbf16>
    %cst_79 = arith.constant dense<0.000000e+00> : vector<8x8xf32>
    %212 = tpu.matmul %210, %211, %cst_79 {dimension_numbers = #tpu.dot_dimension_numbers<[1], [1], [0], [0], [0, 0, 1, 0], [], []>} : vector<8x8xbf16>, vector<8x8xbf16>, vector<8x8xf32> -> vector<8x8xf32>
    %cst_80 = arith.constant dense<0xFF800000> : vector<8xf32>
    %213 = vector.multi_reduction <maximumf>, %212, %cst_80 [1] : vector<8x8xf32> to vector<8xf32>
    %214 = vector.shape_cast %213 : vector<8xf32> to vector<8x1xf32>
    %215 = vector.broadcast %214 : vector<8x1xf32> to vector<8x8xf32>
    %216 = arith.subf %212, %215 : vector<8x8xf32>
    %217 = math.exp %216 : vector<8x8xf32>
    %cst_81 = arith.constant dense<0.000000e+00> : vector<8xf32>
    %218 = vector.multi_reduction <add>, %217, %cst_81 [1] : vector<8x8xf32> to vector<8xf32>
    %219 = vector.shape_cast %218 : vector<8xf32> to vector<8x1xf32>
    %220 = tpu.reciprocal %219 {approx = true} : vector<8x1xf32> -> vector<8x1xf32>
    %221 = vector.broadcast %220 : vector<8x1xf32> to vector<8x8xf32>
    %222 = arith.mulf %217, %221 : vector<8x8xf32>
    %223 = arith.truncf %222 : vector<8x8xf32> to vector<8x8xbf16>
    %224 = vector.extract_strided_slice %168 {offsets = [0, 16], sizes = [8, 8], strides = [1, 1]} : vector<8x32xbf16> to vector<8x8xbf16>
    %cst_82 = arith.constant dense<0.000000e+00> : vector<8x8xf32>
    %225 = tpu.matmul %223, %224, %cst_82 {dimension_numbers = #tpu.dot_dimension_numbers<[1], [0], [0], [1], [0, 0, 1, 1], [], []>} : vector<8x8xbf16>, vector<8x8xbf16>, vector<8x8xf32> -> vector<8x8xf32>
    %226 = arith.truncf %225 : vector<8x8xf32> to vector<8x8xbf16>
    %227 = vector.extract_strided_slice %165 {offsets = [2, 0, 0], sizes = [1, 8, 32], strides = [1, 1, 1]} : vector<4x8x32xbf16> to vector<1x8x32xbf16>
    %228 = vector.shape_cast %227 : vector<1x8x32xbf16> to vector<8x32xbf16>
    %cst_83 = arith.constant dense<0.000000e+00> : vector<8x32xf32>
    %229 = tpu.matmul %226, %228, %cst_83 {dimension_numbers = #tpu.dot_dimension_numbers<[1], [0], [0], [1], [0, 0, 1, 1], [], []>} : vector<8x8xbf16>, vector<8x32xbf16>, vector<8x32xf32> -> vector<8x32xf32>
    %230 = arith.addf %209, %229 : vector<8x32xf32>
    %231 = vector.extract_strided_slice %166 {offsets = [0, 24], sizes = [8, 8], strides = [1, 1]} : vector<8x32xbf16> to vector<8x8xbf16>
    %232 = vector.extract_strided_slice %167 {offsets = [0, 24], sizes = [8, 8], strides = [1, 1]} : vector<8x32xbf16> to vector<8x8xbf16>
    %cst_84 = arith.constant dense<0.000000e+00> : vector<8x8xf32>
    %233 = tpu.matmul %231, %232, %cst_84 {dimension_numbers = #tpu.dot_dimension_numbers<[1], [1], [0], [0], [0, 0, 1, 0], [], []>} : vector<8x8xbf16>, vector<8x8xbf16>, vector<8x8xf32> -> vector<8x8xf32>
    %cst_85 = arith.constant dense<0xFF800000> : vector<8xf32>
    %234 = vector.multi_reduction <maximumf>, %233, %cst_85 [1] : vector<8x8xf32> to vector<8xf32>
    %235 = vector.shape_cast %234 : vector<8xf32> to vector<8x1xf32>
    %236 = vector.broadcast %235 : vector<8x1xf32> to vector<8x8xf32>
    %237 = arith.subf %233, %236 : vector<8x8xf32>
    %238 = math.exp %237 : vector<8x8xf32>
    %cst_86 = arith.constant dense<0.000000e+00> : vector<8xf32>
    %239 = vector.multi_reduction <add>, %238, %cst_86 [1] : vector<8x8xf32> to vector<8xf32>
    %240 = vector.shape_cast %239 : vector<8xf32> to vector<8x1xf32>
    %241 = tpu.reciprocal %240 {approx = true} : vector<8x1xf32> -> vector<8x1xf32>
    %242 = vector.broadcast %241 : vector<8x1xf32> to vector<8x8xf32>
    %243 = arith.mulf %238, %242 : vector<8x8xf32>
    %244 = arith.truncf %243 : vector<8x8xf32> to vector<8x8xbf16>
    %245 = vector.extract_strided_slice %168 {offsets = [0, 24], sizes = [8, 8], strides = [1, 1]} : vector<8x32xbf16> to vector<8x8xbf16>
    %cst_87 = arith.constant dense<0.000000e+00> : vector<8x8xf32>
    %246 = tpu.matmul %244, %245, %cst_87 {dimension_numbers = #tpu.dot_dimension_numbers<[1], [0], [0], [1], [0, 0, 1, 1], [], []>} : vector<8x8xbf16>, vector<8x8xbf16>, vector<8x8xf32> -> vector<8x8xf32>
    %247 = arith.truncf %246 : vector<8x8xf32> to vector<8x8xbf16>
    %248 = vector.extract_strided_slice %165 {offsets = [3, 0, 0], sizes = [1, 8, 32], strides = [1, 1, 1]} : vector<4x8x32xbf16> to vector<1x8x32xbf16>
    %249 = vector.shape_cast %248 : vector<1x8x32xbf16> to vector<8x32xbf16>
    %cst_88 = arith.constant dense<0.000000e+00> : vector<8x32xf32>
    %250 = tpu.matmul %247, %249, %cst_88 {dimension_numbers = #tpu.dot_dimension_numbers<[1], [0], [0], [1], [0, 0, 1, 1], [], []>} : vector<8x8xbf16>, vector<8x32xbf16>, vector<8x32xf32> -> vector<8x32xf32>
    %251 = arith.addf %230, %250 : vector<8x32xf32>
    %c0_89 = arith.constant 0 : index
    %c0_90 = arith.constant 0 : index
    %c0_91 = arith.constant 0 : index
    %252 = vector.load %arg15[%c0_89, %c0_90, %c0_91] : memref<1x1x32xf32, #tpu.memory_space<vmem>>, vector<1x1x32xf32>
    %253 = vector.shape_cast %252 : vector<1x1x32xf32> to vector<1x32xf32>
    %254 = vector.broadcast %253 : vector<1x32xf32> to vector<8x32xf32>
    %255 = arith.addf %251, %254 : vector<8x32xf32>
    %256 = arith.addf %146, %255 : vector<8x32xf32>
    %c0_92 = arith.constant 0 : index
    %c0_93 = arith.constant 0 : index
    %c0_94 = arith.constant 0 : index
    %257 = vector.load %arg16[%c0_92, %c0_93, %c0_94] : memref<1x1x32xf32, #tpu.memory_space<vmem>>, vector<1x1x32xf32>
    %258 = vector.shape_cast %257 : vector<1x1x32xf32> to vector<1x32xf32>
    %c0_95 = arith.constant 0 : index
    %c0_96 = arith.constant 0 : index
    %c0_97 = arith.constant 0 : index
    %259 = vector.load %arg17[%c0_95, %c0_96, %c0_97] : memref<1x1x32xf32, #tpu.memory_space<vmem>>, vector<1x1x32xf32>
    %260 = vector.shape_cast %259 : vector<1x1x32xf32> to vector<1x32xf32>
    %cst_98 = arith.constant dense<0.000000e+00> : vector<8xf32>
    %261 = vector.multi_reduction <add>, %256, %cst_98 [1] : vector<8x32xf32> to vector<8xf32>
    %262 = vector.shape_cast %261 : vector<8xf32> to vector<8x1xf32>
    %cst_99 = arith.constant 3.125000e-02 : f32
    %263 = vector.broadcast %cst_99 : f32 to vector<8x1xf32>
    %264 = arith.mulf %262, %263 : vector<8x1xf32>
    %265 = arith.mulf %256, %256 : vector<8x32xf32>
    %cst_100 = arith.constant dense<0.000000e+00> : vector<8xf32>
    %266 = vector.multi_reduction <add>, %265, %cst_100 [1] : vector<8x32xf32> to vector<8xf32>
    %267 = vector.shape_cast %266 : vector<8xf32> to vector<8x1xf32>
    %cst_101 = arith.constant 3.125000e-02 : f32
    %268 = vector.broadcast %cst_101 : f32 to vector<8x1xf32>
    %269 = arith.mulf %267, %268 : vector<8x1xf32>
    %270 = arith.mulf %264, %264 : vector<8x1xf32>
    %271 = arith.subf %269, %270 : vector<8x1xf32>
    %272 = vector.broadcast %264 : vector<8x1xf32> to vector<8x32xf32>
    %273 = arith.subf %256, %272 : vector<8x32xf32>
    %cst_102 = arith.constant 9.99999974E-6 : f32
    %274 = vector.broadcast %cst_102 : f32 to vector<8x1xf32>
    %275 = arith.addf %271, %274 : vector<8x1xf32>
    %276 = math.rsqrt %275 : vector<8x1xf32>
    %277 = vector.broadcast %276 : vector<8x1xf32> to vector<8x32xf32>
    %278 = arith.mulf %273, %277 : vector<8x32xf32>
    %279 = vector.broadcast %258 : vector<1x32xf32> to vector<8x32xf32>
    %280 = arith.mulf %278, %279 : vector<8x32xf32>
    %281 = vector.broadcast %260 : vector<1x32xf32> to vector<8x32xf32>
    %282 = arith.addf %280, %281 : vector<8x32xf32>
    %283 = arith.truncf %282 : vector<8x32xf32> to vector<8x32xbf16>
    %c0_103 = arith.constant 0 : index
    %c0_104 = arith.constant 0 : index
    %c0_105 = arith.constant 0 : index
    %284 = vector.load %arg18[%c0_103, %c0_104, %c0_105] : memref<1x32x64xbf16, #tpu.memory_space<vmem>>, vector<1x32x64xbf16>
    %285 = vector.shape_cast %284 : vector<1x32x64xbf16> to vector<32x64xbf16>
    %cst_106 = arith.constant dense<0.000000e+00> : vector<8x64xf32>
    %286 = tpu.matmul %283, %285, %cst_106 {dimension_numbers = #tpu.dot_dimension_numbers<[1], [0], [0], [1], [0, 0, 1, 1], [], []>} : vector<8x32xbf16>, vector<32x64xbf16>, vector<8x64xf32> -> vector<8x64xf32>
    %c0_107 = arith.constant 0 : index
    %c0_108 = arith.constant 0 : index
    %c0_109 = arith.constant 0 : index
    %287 = vector.load %arg19[%c0_107, %c0_108, %c0_109] : memref<1x1x64xf32, #tpu.memory_space<vmem>>, vector<1x1x64xf32>
    %288 = vector.shape_cast %287 : vector<1x1x64xf32> to vector<1x64xf32>
    %289 = vector.broadcast %288 : vector<1x64xf32> to vector<8x64xf32>
    %290 = arith.addf %286, %289 : vector<8x64xf32>
    %cst_110 = arith.constant 0.000000e+00 : f32
    %291 = vector.broadcast %cst_110 : f32 to vector<8x64xf32>
    %292 = arith.maximumf %290, %291 : vector<8x64xf32>
    %293 = arith.truncf %292 : vector<8x64xf32> to vector<8x64xbf16>
    %c0_111 = arith.constant 0 : index
    %c0_112 = arith.constant 0 : index
    %c0_113 = arith.constant 0 : index
    %294 = vector.load %arg20[%c0_111, %c0_112, %c0_113] : memref<1x64x32xbf16, #tpu.memory_space<vmem>>, vector<1x64x32xbf16>
    %295 = vector.shape_cast %294 : vector<1x64x32xbf16> to vector<64x32xbf16>
    %cst_114 = arith.constant dense<0.000000e+00> : vector<8x32xf32>
    %296 = tpu.matmul %293, %295, %cst_114 {dimension_numbers = #tpu.dot_dimension_numbers<[1], [0], [0], [1], [0, 0, 1, 1], [], []>} : vector<8x64xbf16>, vector<64x32xbf16>, vector<8x32xf32> -> vector<8x32xf32>
    %c0_115 = arith.constant 0 : index
    %c0_116 = arith.constant 0 : index
    %c0_117 = arith.constant 0 : index
    %297 = vector.load %arg21[%c0_115, %c0_116, %c0_117] : memref<1x1x32xf32, #tpu.memory_space<vmem>>, vector<1x1x32xf32>
    %298 = vector.shape_cast %297 : vector<1x1x32xf32> to vector<1x32xf32>
    %299 = vector.broadcast %298 : vector<1x32xf32> to vector<8x32xf32>
    %300 = arith.addf %296, %299 : vector<8x32xf32>
    %301 = arith.addf %282, %300 : vector<8x32xf32>
    %c0_118 = arith.constant 0 : index
    %c0_119 = arith.constant 0 : index
    %c0_120 = arith.constant 0 : index
    %302 = vector.load %arg22[%c0_118, %c0_119, %c0_120] : memref<1x1x32xf32, #tpu.memory_space<vmem>>, vector<1x1x32xf32>
    %303 = vector.shape_cast %302 : vector<1x1x32xf32> to vector<1x32xf32>
    %c0_121 = arith.constant 0 : index
    %c0_122 = arith.constant 0 : index
    %c0_123 = arith.constant 0 : index
    %304 = vector.load %arg23[%c0_121, %c0_122, %c0_123] : memref<1x1x32xf32, #tpu.memory_space<vmem>>, vector<1x1x32xf32>
    %305 = vector.shape_cast %304 : vector<1x1x32xf32> to vector<1x32xf32>
    %cst_124 = arith.constant dense<0.000000e+00> : vector<8xf32>
    %306 = vector.multi_reduction <add>, %301, %cst_124 [1] : vector<8x32xf32> to vector<8xf32>
    %307 = vector.shape_cast %306 : vector<8xf32> to vector<8x1xf32>
    %cst_125 = arith.constant 3.125000e-02 : f32
    %308 = vector.broadcast %cst_125 : f32 to vector<8x1xf32>
    %309 = arith.mulf %307, %308 : vector<8x1xf32>
    %310 = arith.mulf %301, %301 : vector<8x32xf32>
    %cst_126 = arith.constant dense<0.000000e+00> : vector<8xf32>
    %311 = vector.multi_reduction <add>, %310, %cst_126 [1] : vector<8x32xf32> to vector<8xf32>
    %312 = vector.shape_cast %311 : vector<8xf32> to vector<8x1xf32>
    %cst_127 = arith.constant 3.125000e-02 : f32
    %313 = vector.broadcast %cst_127 : f32 to vector<8x1xf32>
    %314 = arith.mulf %312, %313 : vector<8x1xf32>
    %315 = arith.mulf %309, %309 : vector<8x1xf32>
    %316 = arith.subf %314, %315 : vector<8x1xf32>
    %317 = vector.broadcast %309 : vector<8x1xf32> to vector<8x32xf32>
    %318 = arith.subf %301, %317 : vector<8x32xf32>
    %cst_128 = arith.constant 9.99999974E-6 : f32
    %319 = vector.broadcast %cst_128 : f32 to vector<8x1xf32>
    %320 = arith.addf %316, %319 : vector<8x1xf32>
    %321 = math.rsqrt %320 : vector<8x1xf32>
    %322 = vector.broadcast %321 : vector<8x1xf32> to vector<8x32xf32>
    %323 = arith.mulf %318, %322 : vector<8x32xf32>
    %324 = vector.broadcast %303 : vector<1x32xf32> to vector<8x32xf32>
    %325 = arith.mulf %323, %324 : vector<8x32xf32>
    %326 = vector.broadcast %305 : vector<1x32xf32> to vector<8x32xf32>
    %327 = arith.addf %325, %326 : vector<8x32xf32>
    %c0_129 = arith.constant 0 : index
    %c0_130 = arith.constant 0 : index
    %328 = vector.load %arg25[%c0_129, %c0_130] : memref<8x32xf32, #tpu.memory_space<vmem>>, vector<8x32xf32>
    tpu.vector_store %arg25[%c0_129, %c0_130], %327 {strides = array<i32>} : memref<8x32xf32, #tpu.memory_space<vmem>>, vector<8x32xf32>,
    %c1_i32 = arith.constant 1 : i32
    %329 = arith.cmpi eq, %arg1, %c1_i32 : i32
    %330 = arith.extui %329 : i1 to i32
    %c0_i32_131 = arith.constant 0 : i32
    %331 = arith.cmpi ne, %330, %c0_i32_131 : i32
    scf.if %331 {
      %c0_132 = arith.constant 0 : index
      %c0_133 = arith.constant 0 : index
      %c0_134 = arith.constant 0 : index
      %332 = vector.load %arg24[%c0_132, %c0_133, %c0_134] : memref<1x8x32xf32, #tpu.memory_space<vmem>>, vector<1x8x32xf32>
      %333 = vector.shape_cast %332 : vector<1x8x32xf32> to vector<8x32xf32>
      %334 = vector.shape_cast %327 : vector<8x32xf32> to vector<1x8x32xf32>
      tpu.vector_store %arg24[%c0_132, %c0_133, %c0_134], %334 {strides = array<i32>} : memref<1x8x32xf32, #tpu.memory_space<vmem>>, vector<1x8x32xf32>,
    } else {
    }
    return
  }
  func.func @transform_0(%arg0: i32, %arg1: i32) -> (i32, i32, i32) {
    %c0_i32 = arith.constant 0 : i32
    %c0_i32_0 = arith.constant 0 : i32
    %c0_i32_1 = arith.constant 0 : i32
    return %arg0, %c0_i32, %c0_i32_0 : i32, i32, i32
  }
  func.func @transform_1(%arg0: i32, %arg1: i32) -> (i32, i32, i32) {
    %c0_i32 = arith.constant 0 : i32
    %c0_i32_0 = arith.constant 0 : i32
    %c0_i32_1 = arith.constant 0 : i32
    return %arg0, %c0_i32, %c0_i32_0 : i32, i32, i32
  }
  func.func @transform_2(%arg0: i32, %arg1: i32) -> (i32, i32, i32) {
    %c0_i32 = arith.constant 0 : i32
    %c0_i32_0 = arith.constant 0 : i32
    %c0_i32_1 = arith.constant 0 : i32
    return %arg1, %c0_i32, %c0_i32_0 : i32, i32, i32
  }
  func.func @transform_3(%arg0: i32, %arg1: i32) -> (i32, i32, i32) {
    %c0_i32 = arith.constant 0 : i32
    %c0_i32_0 = arith.constant 0 : i32
    %c0_i32_1 = arith.constant 0 : i32
    return %arg1, %c0_i32, %c0_i32_0 : i32, i32, i32
  }
  func.func @transform_4(%arg0: i32, %arg1: i32) -> (i32, i32, i32, i32) {
    %c0_i32 = arith.constant 0 : i32
    %c0_i32_0 = arith.constant 0 : i32
    %c0_i32_1 = arith.constant 0 : i32
    %c0_i32_2 = arith.constant 0 : i32
    return %arg1, %c0_i32, %c0_i32_0, %c0_i32_1 : i32, i32, i32, i32
  }
  func.func @transform_5(%arg0: i32, %arg1: i32) -> (i32, i32, i32) {
    %c0_i32 = arith.constant 0 : i32
    %c0_i32_0 = arith.constant 0 : i32
    %c0_i32_1 = arith.constant 0 : i32
    return %arg1, %c0_i32, %c0_i32_0 : i32, i32, i32
  }
  func.func @transform_6(%arg0: i32, %arg1: i32) -> (i32, i32, i32) {
    %c0_i32 = arith.constant 0 : i32
    %c0_i32_0 = arith.constant 0 : i32
    %c0_i32_1 = arith.constant 0 : i32
    return %arg1, %c0_i32, %c0_i32_0 : i32, i32, i32
  }
  func.func @transform_7(%arg0: i32, %arg1: i32) -> (i32, i32, i32) {
    %c0_i32 = arith.constant 0 : i32
    %c0_i32_0 = arith.constant 0 : i32
    %c0_i32_1 = arith.constant 0 : i32
    return %arg1, %c0_i32, %c0_i32_0 : i32, i32, i32
  }
  func.func @transform_8(%arg0: i32, %arg1: i32) -> (i32, i32, i32) {
    %c0_i32 = arith.constant 0 : i32
    %c0_i32_0 = arith.constant 0 : i32
    %c0_i32_1 = arith.constant 0 : i32
    return %arg1, %c0_i32, %c0_i32_0 : i32, i32, i32
  }
  func.func @transform_9(%arg0: i32, %arg1: i32) -> (i32, i32, i32) {
    %c0_i32 = arith.constant 0 : i32
    %c0_i32_0 = arith.constant 0 : i32
    %c0_i32_1 = arith.constant 0 : i32
    return %arg1, %c0_i32, %c0_i32_0 : i32, i32, i32
  }
  func.func @transform_10(%arg0: i32, %arg1: i32) -> (i32, i32, i32) {
    %c0_i32 = arith.constant 0 : i32
    %c0_i32_0 = arith.constant 0 : i32
    %c0_i32_1 = arith.constant 0 : i32
    return %arg1, %c0_i32, %c0_i32_0 : i32, i32, i32
  }
  func.func @transform_11(%arg0: i32, %arg1: i32) -> (i32, i32, i32) {
    %c0_i32 = arith.constant 0 : i32
    %c0_i32_0 = arith.constant 0 : i32
    %c0_i32_1 = arith.constant 0 : i32
    return %arg1, %c0_i32, %c0_i32_0 : i32, i32, i32
  }
  func.func @transform_12(%arg0: i32, %arg1: i32) -> (i32, i32, i32, i32) {
    %c0_i32 = arith.constant 0 : i32
    %c0_i32_0 = arith.constant 0 : i32
    %c0_i32_1 = arith.constant 0 : i32
    %c0_i32_2 = arith.constant 0 : i32
    return %arg1, %c0_i32, %c0_i32_0, %c0_i32_1 : i32, i32, i32, i32
  }
  func.func @transform_13(%arg0: i32, %arg1: i32) -> (i32, i32, i32) {
    %c0_i32 = arith.constant 0 : i32
    %c0_i32_0 = arith.constant 0 : i32
    %c0_i32_1 = arith.constant 0 : i32
    return %arg1, %c0_i32, %c0_i32_0 : i32, i32, i32
  }
  func.func @transform_14(%arg0: i32, %arg1: i32) -> (i32, i32, i32) {
    %c0_i32 = arith.constant 0 : i32
    %c0_i32_0 = arith.constant 0 : i32
    %c0_i32_1 = arith.constant 0 : i32
    return %arg1, %c0_i32, %c0_i32_0 : i32, i32, i32
  }
  func.func @transform_15(%arg0: i32, %arg1: i32) -> (i32, i32, i32) {
    %c0_i32 = arith.constant 0 : i32
    %c0_i32_0 = arith.constant 0 : i32
    %c0_i32_1 = arith.constant 0 : i32
    return %arg1, %c0_i32, %c0_i32_0 : i32, i32, i32
  }
  func.func @transform_16(%arg0: i32, %arg1: i32) -> (i32, i32, i32) {
    %c0_i32 = arith.constant 0 : i32
    %c0_i32_0 = arith.constant 0 : i32
    %c0_i32_1 = arith.constant 0 : i32
    return %arg1, %c0_i32, %c0_i32_0 : i32, i32, i32
  }
  func.func @transform_17(%arg0: i32, %arg1: i32) -> (i32, i32, i32) {
    %c0_i32 = arith.constant 0 : i32
    %c0_i32_0 = arith.constant 0 : i32
    %c0_i32_1 = arith.constant 0 : i32
    return %arg1, %c0_i32, %c0_i32_0 : i32, i32, i32
  }
  func.func @transform_18(%arg0: i32, %arg1: i32) -> (i32, i32, i32) {
    %c0_i32 = arith.constant 0 : i32
    %c0_i32_0 = arith.constant 0 : i32
    %c0_i32_1 = arith.constant 0 : i32
    return %arg1, %c0_i32, %c0_i32_0 : i32, i32, i32
  }
  func.func @transform_19(%arg0: i32, %arg1: i32) -> (i32, i32, i32) {
    %c0_i32 = arith.constant 0 : i32
    %c0_i32_0 = arith.constant 0 : i32
    %c0_i32_1 = arith.constant 0 : i32
    return %arg1, %c0_i32, %c0_i32_0 : i32, i32, i32
  }
  func.func @transform_20(%arg0: i32, %arg1: i32) -> (i32, i32, i32) {
    %c0_i32 = arith.constant 0 : i32
    %c0_i32_0 = arith.constant 0 : i32
    %c0_i32_1 = arith.constant 0 : i32
    return %arg1, %c0_i32, %c0_i32_0 : i32, i32, i32
  }
  func.func @transform_21(%arg0: i32, %arg1: i32) -> (i32, i32, i32) {
    %c0_i32 = arith.constant 0 : i32
    %c0_i32_0 = arith.constant 0 : i32
    %c0_i32_1 = arith.constant 0 : i32
    return %arg1, %c0_i32, %c0_i32_0 : i32, i32, i32
  }
  func.func @transform_22(%arg0: i32, %arg1: i32) -> (i32, i32, i32) {
    %c0_i32 = arith.constant 0 : i32
    %c0_i32_0 = arith.constant 0 : i32
    %c0_i32_1 = arith.constant 0 : i32
    return %arg0, %c0_i32, %c0_i32_0 : i32, i32, i32
  }
}

</mosaic_0001>

<bundles_post_ra>
// kernel: tpu_custom_call.1
= control target key start
LH: loop header
LB: loop body
LE: loop exit
PB: predicated region body
PF: predicated region fallthrough
CT: control target
= control target key end

     0   :  { %s4104_s0 = inlined_call_operand.hbm [shape: f32[2,8,32], index: 0, kind: input, shape index: {}]   ;;  %s4105_s1 = inlined_call_operand.hbm [shape: f32[2,8,32], index: 1, kind: input, shape index: {}]   ;;  %s4106_s2 = inlined_call_operand.vmem [shape: bf16[2,32,96], index: 2, kind: input, shape index: {}]   ;;  %s4107_s3 = inlined_call_operand.hbm [shape: f32[2,1,96], index: 3, kind: input, shape index: {}]   ;;  %s4108_s4 = inlined_call_operand.vmem [shape: bf16[2,4,8,32], index: 4, kind: input, shape index: {}]   ;;  %s4109_s5 = inlined_call_operand.vmem [shape: f32[2,1,32], index: 5, kind: input, shape index: {}]   ;;  %s4110_s6 = inlined_call_operand.vmem [shape: f32[2,1,32], index: 6, kind: input, shape index: {}]   ;;  %s4111_s7 = inlined_call_operand.hbm [shape: f32[2,1,32], index: 7, kind: input, shape index: {}]   ;;  %s4112_s8 = inlined_call_operand.vmem [shape: bf16[2,32,32], index: 8, kind: input, shape index: {}]   ;;  %s4113_s9 = inlined_call_operand.vmem [shape: f32[2,1,32], index: 9, kind: input, shape index: {}]   ;;  %s4114_s10 = inlined_call_operand.hbm [shape: bf16[2,32,64], index: 10, kind: input, shape index: {}]   ;;  %s4115_s11 = inlined_call_operand.vmem [shape: f32[2,1,64], index: 11, kind: input, shape index: {}]   ;;  %s4116_s12 = inlined_call_operand.hbm [shape: bf16[2,4,8,32], index: 12, kind: input, shape index: {}]   ;;  %s4117_s13 = inlined_call_operand.vmem [shape: f32[2,1,32], index: 13, kind: input, shape index: {}]   ;;  %s4118_s14 = inlined_call_operand.vmem [shape: f32[2,1,32], index: 14, kind: input, shape index: {}]   ;;  %s4119_s15 = inlined_call_operand.hbm [shape: f32[2,1,32], index: 15, kind: input, shape index: {}]   ;;  %s4120_s16 = inlined_call_operand.hbm [shape: bf16[2,32,64], index: 16, kind: input, shape index: {}]   ;;  %s4121_s17 = inlined_call_operand.vmem [shape: f32[2,1,64], index: 17, kind: input, shape index: {}]   ;;  %s4122_s18 = inlined_call_operand.vmem [shape: bf16[2,64,32], index: 18, kind: input, shape index: {}]   ;;  %s4123_s19 = inlined_call_operand.vmem [shape: f32[2,1,32], index: 19, kind: input, shape index: {}]   ;;  %s4124_s20 = inlined_call_operand.vmem [shape: f32[2,1,32], index: 20, kind: input, shape index: {}]   ;;  %s4125_s21 = inlined_call_operand.hbm [shape: f32[2,1,32], index: 21, kind: input, shape index: {}]   ;;  %s4126_s22 = inlined_call_operand.hbm [shape: f32[2,8,32], index: 22, kind: output, shape index: {}]  }
   0x1   :  { %4154 = sst [smem:[#allocation45_spill]] %s4104_s0 }
   0x2   :  { %4155 = sst [smem:[#allocation46_spill]] %s4105_s1 }
   0x3   :  { %4156 = sst [smem:[#allocation47_spill]] %s4106_s2 }
   0x4   :  { %4157 = sst [smem:[#allocation48_spill]] %s4107_s3 }
   0x5   :  { %4158 = sst [smem:[#allocation49_spill]] %s4108_s4 }
   0x6   :  { %4159 = sst [smem:[#allocation50_spill]] %s4109_s5 }
   0x7   :  { %4160 = sst [smem:[#allocation51_spill]] %s4110_s6 }
   0x8   :  { %4161 = sst [smem:[#allocation52_spill]] %s4111_s7 }
   0x9   :  { %4162 = sst [smem:[#allocation53_spill]] %s4112_s8 }
   0xa   :  { %4163 = sst [smem:[#allocation54_spill]] %s4113_s9 }
   0xb   :  { %4164 = sst [smem:[#allocation55_spill]] %s4114_s10 }
   0xc   :  { %4165 = sst [smem:[#allocation56_spill]] %s4115_s11 }
   0xd   :  { %4166 = sst [smem:[#allocation57_spill]] %s4116_s12 }
   0xe   :  { %4167 = sst [smem:[#allocation58_spill]] %s4117_s13 }
   0xf   :  { %4168 = sst [smem:[#allocation59_spill]] %s4118_s14 }
  0x10   :  { %4169 = sst [smem:[#allocation60_spill]] %s4119_s15 }
  0x11   :  { %4170 = sst [smem:[#allocation61_spill]] %s4120_s16 }
  0x12   :  { %4171 = sst [smem:[#allocation62_spill]] %s4121_s17 }
  0x13   :  { %4172 = sst [smem:[#allocation63_spill]] %s4122_s18 }
  0x14   :  { %4173 = sst [smem:[#allocation64_spill]] %s4123_s19 }
  0x15   :  { %4174 = sst [smem:[#allocation65_spill]] %s4124_s20 }
  0x16   :  { %4175 = sst [smem:[#allocation66_spill]] %s4125_s21 }
  0x17   :  { %4176 = sst [smem:[#allocation67_spill]] %s4126_s22 }
  0x18   :  { %27 = vsyncpa [#allocation4], 0 }
  0x19   :  { %29 = vsyncpa [#allocation4 + $0x1], 0 }
  0x1a   :  { %30 = vsyncpa [#allocation7], 0 }
  0x1b   :  { %32 = vsyncpa [#allocation7 + $0x1], 0 }
  0x1c   :  { %33 = vsyncpa [#allocation10], 0 }
  0x1d   :  { %35 = vsyncpa [#allocation10 + $0x1], 0 }
  0x1e   :  { %36 = vsyncpa [#allocation13], 0 }
  0x1f   :  { %38 = vsyncpa [#allocation13 + $0x1], 0 }
  0x20   :  { %39 = vsyncpa [#allocation16], 0 }
  0x21   :  { %41 = vsyncpa [#allocation16 + $0x1], 0 }
  0x22   :  { %42 = vsyncpa [#allocation5], 0 }
  0x23   :  { %44 = vsyncpa [#allocation5 + $0x1], 0  ;;  %s3447_s3 = smov 0   ;;  %s3449_s28 = smov 0  }
  0x24   :  { %s3451_s29 = smov 0   ;;  %s3453_s30 = smov 0  }
  0x25   :  { %s3455_s4 = smov 0   ;;  %s3457_s0 = smov 0  }
  0x26   :  { %s3459_s23 = smov 0   ;;  %s3461_s1 = smov 0  }
  0x27   :  { %s3463_s5 = smov 0   ;;  %s3465_s24 = smov 0  }
  0x28   :  { %s3467_s6 = smov 0  }
  0x29 LB: > { %4177 = sst [smem:[#allocation26_spill]] %s3280_s28  ;;  %s3503_s25 = sadd.s32 4294967295, %s3316_s6   ;;  %s3316_s6 = sphi %s3467_s6, %s50_s6   ;;  %s3312_s24 = sphi %s3465_s24, %s4277_s24   ;;  %s3308_s5 = sphi %s3463_s5, %s4276_s5   ;;  %s3304_s1 = sphi %s3461_s1, %s4275_s1   ;;  %s3300_s23 = sphi %s3459_s23, %s4274_s23   ;;  %s3296_s0 = sphi %s3457_s0, %s4273_s0   ;;  %s3292_s4 = sphi %s3455_s4, %s4272_s4   ;;  %s3288_s30 = sphi %s3453_s30, %s4271_s30   ;;  %s3284_s29 = sphi %s3451_s29, %s4270_s29   ;;  %s3280_s28 = sphi %s3449_s28, %s4269_s28   ;;  %s3276_s3 = sphi %s3447_s3, %s4268_s3  }
  0x2a   : > { %4178 = sst [smem:[#allocation27_spill]] %s3284_s29  ;;  %s2564_s26 = sadd.s32 4294967294, %s3316_s6  }
  0x2b   : > { %4179 = sst [smem:[#allocation28_spill]] %s3288_s30  ;;  %s59_s2 = sadd.s32 1, %s3308_s5 }
  0x2c   : > { %4180 = sst [smem:[#allocation29_spill]] %s3292_s4  ;;  %s62_s27 = sadd.s32 1, %s3312_s24 }
  0x2d   : > { %4181 = sst [smem:[#allocation30_spill]] %s3296_s0  ;;  %p60_p0 = scmp.ge.s32.totalorder %s59_s2, 2 }
  0x2e   : > { %4182 = sst [smem:[#allocation31_spill]] %s3300_s23  ;;  %s69_s22 = sadd.s32 1, %s3296_s0 }
  0x2f   : > { %4183 = sst [smem:[#allocation32_spill]] %s3304_s1  ;;  %p76_p1 = scmp.ne.s32.totalorder %s3296_s0, %s3292_s4 }
  0x30   : > { %4184 = sst [smem:[#allocation33_spill]] %s3308_s5  ;;  %p77_p2 = scmp.eq.s32.totalorder %s3316_s6, 0 }
  0x31   : > { %4185 = sst [smem:[#allocation34_spill]] %s3312_s24  ;;  %s4279_s2 = smov (%p60_p0, %s59_s2), 0 }
  0x32   : > { %4186 = sst [smem:[#allocation35_spill]] %s3316_s6  ;;  %s4281_s27 = smov (!%p60_p0, %s62_s27), %s3312_s24 }
  0x33   : > { %4187 = sst [smem:[#allocation36_spill]] %s3503_s25  ;;  %p3520_p3 = por %p77_p2, %p76_p1 }
  0x34   : > { %4188 = sst [smem:[#allocation37_spill]] %s4279_s2  ;;  %p4129_p4 = scmp.ne.s32.totalorder %s3292_s4, %s3288_s30 }
  0x35   : > { %p64_p5 = scmp.ge.s32.totalorder %s4281_s27, 2  ;;  %p83_p6 = scmp.eq.s32.totalorder %s3503_s25, 0 }
  0x36   : > { %s144_s20 = ssub.s32 %s3308_s5, %s4279_s2  ;;  %s147_s19 = sadd.s32 1, %s3284_s29 }
  0x37   : > { %s4283_s27 = smov (%p64_p5, %s4281_s27), 0  ;;  %p3537_p7 = por %p83_p6, %p4129_p4 }
  0x38   : > { %4190 = sst [smem:[#allocation38_spill]] %s4283_s27  ;;  %p145_p8 = scmp.eq.s32.totalorder %s144_s20, 0 }
  0x39   : > { %s66_s17 = ssub.s32 %s3312_s24, %s4283_s27  ;;  %p154_p9 = scmp.ne.s32.totalorder %s3284_s29, %s3280_s28 }
  0x3a   : > { %p67_p10 = scmp.eq.s32.totalorder %s66_s17, 0  ;;  %p160_p11 = scmp.ne.s32.totalorder %s3280_s28, %s3276_s3 }
  0x3b   : > { %s3548_s2 = scalar_select %p145_p8, %s3284_s29, %s147_s19  }
  0x3c   : > { %s3551_s14 = scalar_select %p67_p10, %s3296_s0, %s69_s22  }
  0x3d   : > { %4192 = sst [smem:[#allocation39_spill]] %s3548_s2  ;;  %p3555_p12 = por %p154_p9, %p77_p2 }
  0x3e   : > { %4193 = sst [smem:[#allocation40_spill]] %s3551_s14  ;;  %p3561_p13 = por %p160_p11, %p83_p6 }
  0x3f   : > { %p652_p0 = scmp.eq.s32.totalorder %s3503_s25, 3  ;;  %p658_p5 = scmp.eq.s32.totalorder %s2564_s26, 3 }
  0x40   : > { %s4195_s20 = scalar_select %p3561_p13, 1, 0 }
  0x41   : > { %p2749_p4 = scmp.lt.s32.totalorder %s3316_s6, 4  ;;  %p3570_p8 = por %p652_p0, %p76_p1 }
  0x42   : > { %4196 = sst [smem:[#allocation41_spill]] %s4195_s20  ;;  %p4199_p10 = scmp.ne.s32.totalorder %s3292_s4, %s3288_s30 }
  0x43   : > { %s4197_s17 = scalar_select %p3570_p8, 1, 0 }
  0x44   : > { %p3577_p2 = por %p658_p5, %p4199_p10  ;;  %s4135_s22 = sand.u32 1, %s3296_s0  }
  0x45   : > { %4198 = sst [smem:[#allocation42_spill]] %s4197_s17  ;;  %s4136_s3 = sshll.u32 %s3312_s24, 3 }
  0x46   : > { %s4200_s19 = scalar_select %p3577_p2, 1, 0 }
  0x47   : > { %s3585_s27 = sshll.u32 %s4135_s22, 3  ;;  %p3591_p1 = pnand %p2749_p4, %p3520_p3 }
  0x48   : > { %4201 = sst [smem:[#allocation43_spill]] %s4200_s19  ;;  %s3596_s14 = sand.u32 1, %s3316_s6  }
  0x49   : > { %s4203_s30 = sld [smem:[#allocation46_spill]]  ;;  %s701_s22 = scalar_lea.vmem [#allocation6], %s3585_s27 }
  0x4a   : > { %s709_s11 = sshll.u32 %s701_s22, 4  ;;  %p3608_p3 = pnand %p2749_p4, %p3555_p12  ;;  %s710_s11 = int_to_ptr.vmem [resolvable:$true] %s709_s11 }
  0x4b   : > { %s4138_s8 = scalar_lea.sflag [#allocation7], %s3596_s14  ;;  %p2580_p6 = scmp.ge.s32.totalorder %s3316_s6, 1 }
  0x4c   : > { %p934_p9 = scmp.lt.s32.totalorder %s3316_s6, 5  ;;  %s4206_s7 = sld [smem:[#allocation52_spill]] }
  0x4d   : > { %s4207_s12 = sld [smem:[#allocation57_spill]]  ;;  %s4148_s20 = scalar_lea.sflag [#allocation16], %s3596_s14 }
  0x4e   : > { %p3622_p11 = pnand %p2580_p6, %p934_p9  ;;  %s4208_s16 = sld [smem:[#allocation61_spill]] }
  0x4f   : > { %s705_s17 = scalar_lea.hbm %s4203_s30, %s4136_s3  ;;  %s3620_s30 = sand.u32 1, %s3284_s29  }
  0x50   : > { %s707_s1 = sshll.u32 %s705_s17, 4  ;;  %s764_s3 = scalar_lea.vmem [#allocation9], %s3620_s30  ;;  %s708_s1 = int_to_ptr.hbm [resolvable:$true] %s707_s1 }
  0x51   : > { %2723 = dma.hbm_to_vmem [thread:$0]  (!%p3591_p1), %s708_s1, 128, %s710_s11, %s4138_s8  }
  0x52   : > { %s767_s19 = scalar_lea.hbm %s4206_s7, %s3308_s5  ;;  %s771_s23 = sshll.u32 %s764_s3, 4  ;;  %s772_s23 = int_to_ptr.vmem [resolvable:$true] %s771_s23 }
  0x53   : > { %s769_s22 = sshll.u32 %s767_s19, 4  ;;  %s4140_s11 = scalar_lea.sflag [#allocation10], %s3596_s14  ;;  %s770_s22 = int_to_ptr.hbm [resolvable:$true] %s769_s22 }
  0x54   : > { %2729 = dma.hbm_to_vmem [thread:$0]  (!%p3608_p3), %s770_s22, 16, %s772_s23, %s4140_s11  }
  0x55   : > { %s3637_s1 = sshll.u32 %s3620_s30, 4  ;;  %s3640_s8 = sshll.u32 %s3308_s5, 4 }
  0x56   : > { %s829_s3 = scalar_lea.hbm %s4207_s12, %s3640_s8  ;;  %s824_s19 = scalar_lea.vmem [#allocation12], %s3637_s1 }
  0x57   : > { %s832_s7 = sshll.u32 %s824_s19, 4  ;;  %s830_s29 = sshll.u32 %s829_s3, 4  ;;  %s833_s7 = int_to_ptr.vmem [resolvable:$true] %s832_s7  ;;  %s831_s29 = int_to_ptr.hbm [resolvable:$true] %s830_s29 }
  0x58   : > { %s4145_s23 = scalar_lea.sflag [#allocation13], %s3596_s14  ;;  %s3318_s22 = smov 64  }
  0x59   : > { %s3319_s11 = smov 4   ;;  %s880_s19 = scalar_lea.hbm %s4208_s16, %s3640_s8 }
  0x5a   : > { %2735 = dma.hbm_to_vmem [thread:$0]  (!%p3608_p3), %s831_s29, 256, %s833_s7, %s4145_s23, %s3318_s22, %s3318_s22, %s3319_s11  }
  0x5b   : > { %s881_s3 = sshll.u32 %s880_s19, 4  ;;  %s875_s12 = scalar_lea.vmem [#allocation15], %s3637_s1  ;;  %s882_s3 = int_to_ptr.hbm [resolvable:$true] %s881_s3 }
  0x5c   : > { %s883_s6 = sshll.u32 %s875_s12, 4  ;;  %s4209_s7 = sshll.u32 %s3312_s24, 3  ;;  %s884_s6 = int_to_ptr.vmem [resolvable:$true] %s883_s6 }
  0x5d   : > { %2741 = dma.hbm_to_vmem [thread:$0]  (!%p3608_p3), %s882_s3, 256, %s884_s6, %s4148_s20, %s3318_s22, %s3318_s22, %s3319_s11  }
  0x5e   : > { %s4210_s17 = sld [smem:[#allocation45_spill]]  ;;  %s682_s23 = scalar_lea.vmem [#allocation3], %s3585_s27 }
  0x5f   : > { %s690_s12 = sshll.u32 %s682_s23, 4  ;;  %s4211_s28 = sand.u32 1, %s3296_s0   ;;  %s691_s12 = int_to_ptr.vmem [resolvable:$true] %s690_s12 }
  0x60   : > { %s679_s25 = scalar_lea.sflag [#allocation4], %s4211_s28  ;;  %s4212_s20 = sld [smem:[#allocation48_spill]] }
  0x61   : > { %s727_s13 = scalar_lea.vmem [#allocation8], %s3620_s30  ;;  %s4213_s27 = scalar_lea.sflag [#allocation7], %s3596_s14 }
  0x62   : > { %s4214_s10 = sld [smem:[#allocation55_spill]]  ;;  %s922_s28 = scalar_lea.vmem [#allocation17], %s3620_s30 }
  0x63   : > { %s4216_s15 = sld [smem:[#allocation60_spill]]  ;;  %s929_s26 = sshll.u32 %s922_s28, 4  ;;  %s930_s26 = int_to_ptr.vmem [resolvable:$true] %s929_s26 }
  0x64   : > { %s686_s19 = scalar_lea.hbm %s4210_s17, %s4209_s7  ;;  %s734_s7 = sshll.u32 %s727_s13, 4  ;;  %s735_s7 = int_to_ptr.vmem [resolvable:$true] %s734_s7 }
  0x65   : > { %s688_s16 = sshll.u32 %s686_s19, 4  ;;  %s4218_s21 = sld [smem:[#allocation66_spill]]  ;;  %s689_s16 = int_to_ptr.hbm [resolvable:$true] %s688_s16 }
  0x66   : > { %2720 = dma.hbm_to_vmem [thread:$0]  (!%p3591_p1), %s689_s16, 128, %s691_s12, %s679_s25  }
  0x67   : > { %s730_s29 = scalar_lea.hbm %s4212_s20, %s3308_s5  ;;  %s796_s25 = scalar_lea.vmem [#allocation11], %s3637_s1 }
  0x68   : > { %s732_s17 = sshll.u32 %s730_s29, 4  ;;  %s801_s16 = scalar_lea.hbm %s4214_s10, %s3640_s8  ;;  %s733_s17 = int_to_ptr.hbm [resolvable:$true] %s732_s17 }
  0x69   : > { %2726 = dma.hbm_to_vmem [thread:$0]  (!%p3608_p3), %s733_s17, 16, %s735_s7, %s4213_s27  }
  0x6a   : > { %s804_s23 = sshll.u32 %s796_s25, 4  ;;  %s802_s19 = sshll.u32 %s801_s16, 4  ;;  %s805_s23 = int_to_ptr.vmem [resolvable:$true] %s804_s23  ;;  %s803_s19 = int_to_ptr.hbm [resolvable:$true] %s802_s19 }
  0x6b   : > { %s4215_s20 = scalar_lea.sflag [#allocation10], %s3596_s14  ;;  %s860_s3 = scalar_lea.hbm %s4216_s15, %s3308_s5 }
  0x6c   : > { %2732 = dma.hbm_to_vmem [thread:$0]  (!%p3608_p3), %s803_s19, 256, %s805_s23, %s4215_s20, %s3318_s22, %s3318_s22, %s3319_s11  }
  0x6d   : > { %s857_s29 = scalar_lea.vmem [#allocation14], %s3620_s30  ;;  %s862_s8 = sshll.u32 %s860_s3, 4  ;;  %s863_s8 = int_to_ptr.hbm [resolvable:$true] %s862_s8 }
  0x6e   : > { %s864_s13 = sshll.u32 %s857_s29, 4  ;;  %s4217_s1 = scalar_lea.sflag [#allocation13], %s3596_s14  ;;  %s865_s13 = int_to_ptr.vmem [resolvable:$true] %s864_s13 }
  0x6f   : > { %2738 = dma.hbm_to_vmem [thread:$0]  (!%p3608_p3), %s863_s8, 16, %s865_s13, %s4217_s1  }
  0x70   : > { %s925_s27 = scalar_lea.hbm %s4218_s21, %s3308_s5  ;;  %s4219_s11 = scalar_lea.sflag [#allocation16], %s3596_s14 }
  0x71   : > { %s927_s16 = sshll.u32 %s925_s27, 4  ;;  %938 = sbr.rel (%p3622_p11) target bundleno = 3712 (0xe80), region = 108  ;;  %s928_s16 = int_to_ptr.hbm [resolvable:$true] %s927_s16 }
  0x72   : > { %2744 = dma.hbm_to_vmem [thread:$0]  (!%p3608_p3), %s928_s16, 16, %s930_s26, %s4219_s11  }
  0x76   : > { %s3720_s22 = sand.u32 1, %s3292_s4  }
  0x77   : > { %4220 = sst [smem:[#allocation44_spill]] %s3720_s22  ;;  %s3723_s25 = sshll.u32 %s3720_s22, 3 }
  0x78   : > { %s941_s30 = scalar_lea.sflag [#allocation4], %s3720_s22 }
  0x79   : > { %3247 = dma.done.wait (%p3537_p7), %s941_s30, 128  }
  0x7a   : > { %3249 = vsyncadd (%p3537_p7), %s941_s30, 4294967168  ;;  %s4221_s9 = sld [smem:[#allocation36_spill]] }
  0x80   : > { %s950_s14 = sand.u32 1, %s4221_s9  }
  0x81   : > { %s951_s2 = scalar_lea.sflag [#allocation7], %s950_s14 }
  0x82   : > { %3251 = dma.done.wait (%p3537_p7), %s951_s2, 128  }
  0x83   : > { %3253 = vsyncadd (%p3537_p7), %s951_s2, 4294967168  ;;  %s4222_s20 = sld [smem:[#allocation26_spill]] }
  0x89   : > { %s3738_s6 = sand.u32 1, %s4222_s20  }
  0x8a   : > { %3255 = dma.done.wait (%p3561_p13), %s951_s2, 16  }
  0x8b   : > { %3257 = vsyncadd (%p3561_p13), %s951_s2, 4294967280  ;;  %s970_s29 = scalar_lea.sflag [#allocation10], %s950_s14 }
  0x8c   : > { %3259 = dma.done.wait (%p3561_p13), %s970_s29, 272  }
  0x8d   : > { %3261 = vsyncadd (%p3561_p13), %s970_s29, 4294967024  ;;  %s3751_s18 = sshll.u32 %s3738_s6, 4  ;;  %s989_s1 = scalar_lea.sflag [#allocation13], %s950_s14 }
  0x8e   : > { %s3755_s7 = scalar_lea.vmem [#allocation12], %s3751_s18 }
  0x8f   : > { %3263 = dma.done.wait (%p3561_p13), %s989_s1, 272  }
  0x90   : > { %3265 = vsyncadd (%p3561_p13), %s989_s1, 4294967024  ;;  %s1008_s27 = scalar_lea.sflag [#allocation16], %s950_s14 }
  0x91   : > { %3267 = dma.done.wait (%p3561_p13), %s1008_s27, 272  }
  0x92   : > { %3269 = vsyncadd (%p3561_p13), %s1008_s27, 4294967024  ;;  %s4224_s26 = sld [smem:[#allocation31_spill]]  ;;  %s1020_s4 = scalar_lea.vmem [#allocation17], %s3738_s6 }
  0x93   : > { %s4226_s29 = sld [smem:[#allocation47_spill]]  ;;  %s1164_s19 = scalar_lea.vmem [#allocation18], %s3723_s25 }
  0x94   : > { %s4227_s28 = sld [smem:[#allocation49_spill]] }
  0x95   : > { %s4229_s21 = sld [smem:[#allocation53_spill]] }
  0x96   : > { %s4233_s3 = sld [smem:[#allocation59_spill]] }
  0x97   : > { %s4234_s15 = sld [smem:[#allocation62_spill]] }
  0x98   : > { %p1165_p4 = scmp.lt.s32.totalorder %s4224_s26, 1  ;;  %s4235_s9 = sld [smem:[#allocation63_spill]] }
  0x99   : > { %s4237_s27 = sld [smem:[#allocation65_spill]]  ;;  %p2595_p7 = scmp.ne.s32.totalorder %s4224_s26, 0 }
  0x9a   : > { %s3769_s16 = scalar_select %p1165_p4, %s4224_s26, 1 }
  0x9b   : > { %s4238_s23 = scalar_lea.vmem (!%p2595_p7), [#allocation3], %s3723_s25 }
  0x9c   : > { %s2681_s11 = sshll.u32 %s3769_s16, 4  ;;  %s1197_s8 = scalar_lea.vmem %s4233_s3, %s3769_s16 }
  0x9d   : > { %s1169_s1 = scalar_lea.vmem %s4226_s29, %s2681_s11  ;;  %s3782_s13 = scalar_lea.vmem %s4227_s28, %s2681_s11 }
  0x9e   : > { %s3791_s24 = scalar_lea.vmem %s4229_s21, %s2681_s11  ;;  %s4231_s29 = sld [smem:[#allocation56_spill]] }
  0x9f   : > { %s1200_s21 = scalar_lea.vmem %s4234_s15, %s3769_s16  ;;  %s2684_s11 = sshll.u32 %s3769_s16, 5 }
  0xa0   : > { %s3817_s14 = scalar_lea.vmem %s4235_s9, %s2684_s11  ;;  %s1211_s0 = scalar_lea.vmem %s4237_s27, %s3769_s16 }
  0xa4   : > { %s1191_s5 = scalar_lea.vmem %s4231_s29, %s3769_s16  ;;  %s4236_s29 = sld [smem:[#allocation64_spill]] }
  0xa6   : > { %1216 = sbr.rel (%p2595_p7) target bundleno = 173 (0xad), region = 148 }
  0xaa   : > { %s1208_s2 = scalar_lea.vmem %s4236_s29, %s3769_s16 }
  0xab   : > { %v1217_v0 = vld [vmem:[%s4238_s23] sm:$0xff]  ;;  %vm1218_vm0 = vcmask 261120  }
  0xac   : > { %1219 = vst.msk [vmem:[#allocation2] sm:$0xff] %vm1218_vm0, %v1217_v0 }
  0xad PF: > { %v2686_v1 = vld [vmem:[%s1169_s1 + $0x8] sm:$0xff]  ;;  %v2685_v2 = vld [vmem:[%s1169_s1] sm:$0xff]  ;;  %vm1250_vm1 = vcmask 261120   ;;  %s4239_s22 = scalar_lea.vmem [#allocation8], %s3738_s6  ;;  %s3320_s26 = smov 88   ;;  %vm1277_vm2 = vcmask 64512   ;;  %v1223_v24 = vlaneseq }
  0xae   : > { %1260 = vmatpush.bf16.msra.mxu0 %v2686_v1  ;;  %v2853_v5 = vld [vmem:[%s4239_s22] ss:$0 sm:$0xff]  ;;  %s3321_s1 = smov 96   ;;  %s3322_s3 = smov 120   ;;  %vm1314_vm3 = vcmask 1043456   ;;  %vm2123_vm11 = vcmask 523264  }
  0xaf   : > { %s3323_s10 = smov 80   ;;  %s3324_s15 = smov 72   ;;  %v1267_v17 = vld [vmem:[%s3782_s13] sm:$0xf]  ;;  %v1224_v25 = vshrl.u32 %v1223_v24, 7  ;;  %v1226_v26 = vand.u32 127, %v1223_v24 }
  0xb0   : > { %s3325_s11 = smov 112   ;;  %v1412_v20 = vsel %vm1314_vm3, %v1267_v17, 0  ;;  %v3326_v27 = vmov -1e+30   ;;  %s3327_s30 = smov 56  }
  0xb1   : > { %vm1227_vm4 = vcmp.le.s32.totalorder %v1226_v26, %v1224_v25  ;;  %s3328_s9 = smov 40   ;;  %s3329_s20 = smov 64  }
  0xb2   : > { %1261 = vmatpush.bf16.msra.mxu0 %v2685_v2  ;;  %v3862_v28 = vsel %vm1227_vm4, 0.0, %v3326_v27  ;;  %s3330_s12 = smov 104   ;;  %v1268_v2 = vld [vmem:[%s3782_s13 + $0x4] sm:$0xf]  ;;  %s3331_s29 = smov 48  }
  0xb3   : > { %v3832_v3 = vld [vmem:[#allocation2] sm:$0xff]  ;;  %s4240_s28 = sld [smem:[#allocation50_spill]]  ;;  %s4242_s23 = scalar_lea.vmem [#allocation11], %s3751_s18 }
  0xb4   : > { %v1229_v4 = vpack.c.bf16 %v3832_v3, %v3832_v3  ;;  %s4243_s22 = smov %s4242_s23  ;;  %s4247_s17 = scalar_lea.vmem [#allocation9], %s3738_s6 }
  0xb6   : > { %2604 = vmatmul.msk.bf16.vlgmr.msra.gmra.mxu0 %vm1250_vm1, %v1229_v4  ;;  %v1393_v4 = vsel %vm1314_vm3, %v1268_v2, 0  ;;  %v2687_v2 = vld [vmem:[%s3791_s24] sm:$0xff] }
  0xb7   : > { %1402 = vmatpush.bf16.msrb.mxu0 %v1393_v4 }
  0xb9   : > { %s4241_s27 = scalar_lea.vmem %s4240_s28, %s3769_s16  ;;  %s4260_s28 = sld [smem:[#allocation31_spill]] }
  0xbf   : > { %p2673_p12 = scmp.ne.s32.totalorder %s4260_s28, 1 }
 0x133   : > { %v1263_v6 = vpop.f32.mrf.mxu0 }
 0x134   : > { %v1264_v7 = vadd.f32 %v2853_v5, %v1263_v6 }
 0x136   : > { %v1271_v8 = vpack.c.bf16 %v1264_v7, %v1264_v7 }
 0x138   : > { %v1273_v9 = vunpack.c.l.b16 %v1271_v8 }
 0x13a   : > { %v3839_v10 = vpack.c.b16 %v1273_v9, %v1273_v9 }
 0x13b   : > { %v1265_v11 = vpop.f32.mrf.mxu0 }
 0x13c   : > { %1334 = vrot.lane.b32.xlu2 %v3839_v10, %s3320_s26  ;;  %1275 = vrot.lane.b32.xlu0 %v3839_v10, %s3321_s1 }
 0x144   : > { %1332 = vrot.lane.b32.xlu2 %v3839_v10, %s3322_s3 }
 0x14c   : > { %1429 = vrot.lane.b32.xlu2 %v3839_v10, %s3323_s10 }
 0x154   : > { %1506 = vrot.lane.b32.xlu2 %v3839_v10, %s3324_s15 }
 0x15c   : > { %1427 = vrot.lane.b32.xlu2 %v3839_v10, %s3325_s11 }
 0x196   : > { %v1335_v12 = vpop.permute.xlu2 %1334 }
 0x197   : > { %v1340_v13 = vsel %vm1277_vm2, %v1335_v12, 0 }
 0x198   : > { %1349 = vmatpush.bf16.xpose.msra.mxu3 %v1340_v13 }
 0x19e   : > { %v1333_v14 = vpop.permute.xlu2 %1332 }
 0x19f   : > { %2607 = vmatmul.msk.bf16.vlgmr.msra.gmra.mxu3 %vm1277_vm2, %v1333_v14 }
 0x1a6   : > { %v1430_v15 = vpop.permute.xlu2 %1429 }
 0x1a7   : > { %v1435_v16 = vsel %vm1277_vm2, %v1430_v15, 0 }
 0x1a8   : > { %1444 = vmatpush.bf16.xpose.msrb.mxu3 %v1435_v16 }
 0x1ae   : > { %v1507_v18 = vpop.permute.xlu2 %1506  ;;  %v1276_v19 = vpop.permute.xlu0 %1275 }
 0x1af   : > { %v1282_v21 = vsel %vm1277_vm2, %v1276_v19, 0  ;;  %v1512_v23 = vsel %vm1277_vm2, %v1507_v18, 0 }
 0x1b0   : > { %1291 = vmatpush.bf16.xpose.msra.mxu1 %v1282_v21 }
 0x1b6   : > { %v1428_v22 = vpop.permute.xlu2 %1427 }
 0x1b7   : > { %2605 = vmatmul.msk.bf16.vlgmr.msra.gmra.mxu1 %vm1277_vm2, %v1271_v8  ;;  %2611 = vmatmul.msk.bf16.vlgmr.msrb.gmra.mxu3 %vm1277_vm2, %v1428_v22 }
 0x1b8   : > { %1421 = vmatpush.bf16.msrb.mxu1 %v1412_v20 }
 0x1bc   : > { %1521 = vmatpush.bf16.xpose.msra.mxu1 %v1512_v23 }
 0x222   : > { %v1351_v29 = vpop.f32.mrf.mxu3 }
 0x223   : > { %v1352_v30 = vadd.f32 %v1351_v29, %v3862_v28 }
 0x225   : > { %v1355_v31 = vsel %vm1277_vm2, %v1352_v30, -inf }
 0x226   : > { %1356 = vmax.xlane.f32.xlu2 %v1355_v31 }
 0x22a   : > { %v1353_v32 = vpop.f32.mrf.mxu3 }
 0x234   : > { %v1293_v33 = vpop.f32.mrf.mxu1 }
 0x235   : > { %v1294_v34 = vadd.f32 %v1293_v33, %v3862_v28 }
 0x237   : > { %v1297_v35 = vsel %vm1277_vm2, %v1294_v34, -inf }
 0x238   : > { %1298 = vmax.xlane.f32.xlu0 %v1297_v35 }
 0x23a   : > { %v1446_v36 = vpop.f32.mrf.mxu3 }
 0x23b   : > { %v3869_v37 = vadd.f32 %v1446_v36, %v3862_v28 }
 0x23c   : > { %v1295_v38 = vpop.f32.mrf.mxu1 }
 0x23d   : > { %v1450_v39 = vsel %vm1277_vm2, %v3869_v37, -inf }
 0x240   : > { %1451 = vmax.xlane.f32.xlu0 %v1450_v39 }
 0x242   : > { %v1448_v40 = vpop.f32.mrf.mxu3 }
 0x299   : > { %v1357_v41 = vpop.xlane.xlu2 %1356 }
 0x29a   : > { %v1358_v42 = vsub.f32 %v1352_v30, %v1357_v41 }
 0x29c   : > { %v1359_v43 = vmul.f32 1.442695, %v1358_v42  ;;  %v1269_v42 = vld [vmem:[%s3782_s13 + $0x8] sm:$0xf] }
 0x29e   : > { %2866 = vpow2.f32 %v1359_v43  ;;  %v1488_v43 = vsel %vm1314_vm3, %v1269_v42, 0 }
 0x29f   : > { %1497 = vmatpush.bf16.msra.mxu0 %v1488_v43 }
 0x2a4   : > { %v2867_v44 = vpop.eup %2866 }
 0x2a5   : > { %v1361_v45 = vsel %vm1277_vm2, %v2867_v44, 0.0 }
 0x2a6   : > { %1362 = vadd.xlane.f32.xlu0 %v1361_v45 }
 0x2ab   : > { %v1299_v46 = vpop.xlane.xlu0 %1298 }
 0x2ac   : > { %v1300_v47 = vsub.f32 %v1294_v34, %v1299_v46 }
 0x2ae   : > { %v1301_v48 = vmul.f32 1.442695, %v1300_v47 }
 0x2b0   : > { %2868 = vpow2.f32 %v1301_v48 }
 0x2b3   : > { %v1452_v51 = vpop.xlane.xlu0 %1451 }
 0x2b4   : > { %v1453_v15 = vsub.f32 %v3869_v37, %v1452_v51 }
 0x2b6   : > { %v2869_v49 = vpop.eup %2868  ;;  %v1454_v16 = vmul.f32 1.442695, %v1453_v15 }
 0x2b7   : > { %v1303_v50 = vsel %vm1277_vm2, %v2869_v49, 0.0 }
 0x2b8   : > { %1304 = vadd.xlane.f32.xlu1 %v1303_v50 }
 0x2ba   : > { %1367 = vrot.lane.b32.xlu0 %v3839_v10, %s3327_s30  ;;  %s4244_s30 = scalar_lea.vmem [#allocation6], %s3723_s25 }
 0x2c2   : > { %1539 = vrot.lane.b32.xlu0 %v3839_v10, %s3328_s9 }
 0x2d1   : > { %1309 = vrot.lane.b32.xlu1 %v3839_v10, %s3329_s20  ;;  %s4245_s20 = sld [smem:[#allocation51_spill]] }
 0x2d9   : > { %1504 = vrot.lane.b32.xlu1 %v3839_v10, %s3330_s12 }
 0x319   : > { %v1363_v52 = vpop.xlane.xlu0 %1362 }
 0x32b   : > { %v1305_v56 = vpop.xlane.xlu1 %1304 }
 0x32c   : > { %v1368_v53 = vpop.permute.xlu0 %1367  ;;  %2870 = vrcp.f32 %v1305_v56 }
 0x32d   : > { %v1373_v61 = vsel %vm1314_vm3, %v1368_v53, 0  ;;  %2872 = vrcp.f32 %v1363_v52  ;;  %v2854_v52 = vld [vmem:[%s4241_s27] ss:$0 sm:$0xff] }
 0x32e   : > { %2874 = vpow2.f32 %v1454_v16 }
 0x332   : > { %v2871_v57 = vpop.eup %2870 }
 0x333   : > { %v1307_v58 = vmul.f32 %v2871_v57, %v2869_v49  ;;  %v2873_v63 = vpop.eup %2872 }
 0x334   : > { %v1540_v54 = vpop.permute.xlu0 %1539  ;;  %v1365_v0 = vmul.f32 %v2873_v63, %v2867_v44  ;;  %v2875_v22 = vpop.eup %2874  ;;  %v2689_v63 = vld [vmem:[%s4243_s22] sm:$0xff] }
 0x335   : > { %v1545_v55 = vsel %vm1314_vm3, %v1540_v54, 0  ;;  %v1308_v62 = vpack.c.bf16 %v1307_v58, %v1307_v58  ;;  %v1456_v25 = vsel %vm1277_vm2, %v2875_v22, 0.0 }
 0x336   : > { %1554 = vmatpush.bf16.msra.mxu3 %v1545_v55  ;;  %v1366_v1 = vpack.c.bf16 %v1365_v0, %v1365_v0  ;;  %v1221_v0 = vld [vmem:[%s4244_s30] sm:$0xff]  ;;  %s4249_s30 = sld [smem:[#allocation54_spill]] }
 0x343   : > { %v1310_v59 = vpop.permute.xlu1 %1309 }
 0x344   : > { %v1316_v60 = vsel %vm1314_vm3, %v1310_v59, 0 }
 0x345   : > { %1325 = vmatpush.bf16.msra.mxu2 %v1316_v60 }
 0x348   : > { %2606 = vmatmul.msk.bf16.vlgmr.msra.gmra.mxu2 %vm1277_vm2, %v1308_v62  ;;  %v2690_v62 = vld [vmem:[%s4242_s23 + $0x8] sm:$0xff] }
 0x349   : > { %1382 = vmatpush.bf16.msrb.mxu2 %v1373_v61 }
 0x34b   : > { %v1505_v11 = vpop.permute.xlu1 %1504 }
 0x358   : > { %2608 = vmatmul.msk.bf16.vlgmr.msrb.gmra.mxu2 %vm1277_vm2, %v1366_v1  ;;  %v1222_v1 = vpack.c.bf16 %v1221_v0, %v1221_v0 }
 0x3cb   : > { %v1327_v5 = vpop.f32.mrf.mxu2 }
 0x3cc   : > { %v1331_v6 = vpack.c.bf16 %v1327_v5, %v1327_v5 }
 0x3ce   : > { %2610 = vmatmul.msk.bf16.vlgmr.msrb.gmra.mxu1 %vm1277_vm2, %v1331_v6 }
 0x3cf   : > { %1687 = vmatpush.bf16.msrb.mxu1 %v2690_v62 }
 0x3d3   : > { %v1329_v7 = vpop.f32.mrf.mxu2  ;;  %1688 = vmatpush.bf16.msrb.mxu1 %v2689_v63 }
 0x3db   : > { %v1384_v8 = vpop.f32.mrf.mxu2 }
 0x3dc   : > { %v1388_v9 = vpack.c.bf16 %v1384_v8, %v1384_v8 }
 0x3de   : > { %2609 = vmatmul.msk.bf16.vlgmr.msrb.gmra.mxu0 %vm1277_vm2, %v1388_v9  ;;  %2614 = vmatmul.msk.bf16.vlgmr.msra.gmra.mxu1 %vm1277_vm2, %v1505_v11 }
 0x3e3   : > { %v1386_v12 = vpop.f32.mrf.mxu2 }
 0x3ee   : > { %2634 = vmatmul.msk.bf16.vlgmr.msrb.gmra.mxu1 %vm1250_vm1, %v1222_v1 }
 0x44b   : > { %v1423_v13 = vpop.f32.mrf.mxu1 }
 0x453   : > { %v1425_v14 = vpop.f32.mrf.mxu1 }
 0x45b   : > { %v1404_v17 = vpop.f32.mrf.mxu0  ;;  %v1523_v18 = vpop.f32.mrf.mxu1 }
 0x45c   : > { %v1424_v19 = vadd.f32 %v1423_v13, %v1404_v17  ;;  %v1524_v20 = vadd.f32 %v1523_v18, %v3862_v28 }
 0x45e   : > { %v1527_v21 = vsel %vm1277_vm2, %v1524_v20, -inf }
 0x45f   : > { %1528 = vmax.xlane.f32.xlu1 %v1527_v21 }
 0x463   : > { %v1406_v23 = vpop.f32.mrf.mxu0  ;;  %v1525_v24 = vpop.f32.mrf.mxu1 }
 0x467   : > { %1457 = vadd.xlane.f32.xlu1 %v1456_v25 }
 0x4d2   : > { %v1529_v26 = vpop.xlane.xlu1 %1528 }
 0x4d3   : > { %v1530_v27 = vsub.f32 %v1524_v20, %v1529_v26  ;;  %v2857_v26 = vld [vmem:[%s1191_s5] ss:$0 sm:$0xff]  ;;  %s4250_s5 = scalar_lea.vmem %s4249_s30, %s3769_s16 }
 0x4d5   : > { %v1531_v29 = vmul.f32 1.442695, %v1530_v27  ;;  %v1690_v27 = vpop.f32.mrf.mxu1 }
 0x4d7   : > { %2876 = vpow2.f32 %v1531_v29  ;;  %v1691_v29 = vadd.f32 %v2857_v26, %v1690_v27 }
 0x4da   : > { %v1458_v28 = vpop.xlane.xlu1 %1457 }
 0x4db   : > { %2878 = vrcp.f32 %v1458_v28 }
 0x4dd   : > { %v2877_v30 = vpop.eup %2876 }
 0x4de   : > { %v1533_v31 = vsel %vm1277_vm2, %v2877_v30, 0.0 }
 0x4df   : > { %1534 = vadd.xlane.f32.xlu2 %v1533_v31 }
 0x4e1   : > { %v2879_v33 = vpop.eup %2878 }
 0x4e2   : > { %v1460_v35 = vmul.f32 %v2879_v33, %v2875_v22  ;;  %v2856_v22 = vld [vmem:[%s4247_s17] ss:$0 sm:$0xff]  ;;  %v1692_v33 = vpop.f32.mrf.mxu1 }
 0x4e4   : > { %v1461_v40 = vpack.c.bf16 %v1460_v35, %v1460_v35 }
 0x4f7   : > { %1462 = vrot.lane.b32.xlu2 %v3839_v10, %s3331_s29  ;;  %v1270_v10 = vld [vmem:[%s3782_s13 + $0xc] sm:$0xf]  ;;  %s4246_s29 = scalar_lea.vmem %s4245_s20, %s3769_s16 }
 0x4f8   : > { %v1565_v41 = vsel %vm1314_vm3, %v1270_v10, 0 }
 0x552   : > { %v1535_v32 = vpop.xlane.xlu2 %1534 }
 0x553   : > { %2880 = vrcp.f32 %v1535_v32 }
 0x559   : > { %v2881_v34 = vpop.eup %2880 }
 0x55a   : > { %v1537_v36 = vmul.f32 %v2881_v34, %v2877_v30  ;;  %v1463_v37 = vpop.permute.xlu2 %1462  ;;  %v1699_v30 = vpack.c.bf16 %v1691_v29, %v1691_v29  ;;  %v2858_v34 = vld [vmem:[%s4250_s5] ss:$0 sm:$0xff] }
 0x55b   : > { %v1468_v38 = vsel %vm1314_vm3, %v1463_v37, 0 }
 0x55c   : > { %v1538_v39 = vpack.c.bf16 %v1537_v36, %v1537_v36  ;;  %1477 = vmatpush.bf16.msra.mxu2 %v1468_v38  ;;  %v1704_v31 = vsel %vm1277_vm2, %v1699_v30, 0  ;;  %v1732_v28 = vunpack.c.l.b16 %v1699_v30 }
 0x55d   : > { %1713 = vmatpush.bf16.xpose.msrb.mxu3 %v1704_v31 }
 0x55e   : > { %2615 = vmatmul.msk.bf16.vlgmr.msra.gmra.mxu3 %vm1277_vm2, %v1538_v39  ;;  %v3940_v32 = vpack.c.b16 %v1732_v28, %v1732_v28 }
 0x55f   : > { %2612 = vmatmul.msk.bf16.vlgmr.msra.gmra.mxu2 %vm1277_vm2, %v1461_v40 }
 0x560   : > { %1574 = vmatpush.bf16.msrb.mxu2 %v1565_v41  ;;  %1734 = vrot.lane.b32.xlu2 %v3940_v32, %s3321_s1 }
 0x5ba   : > { %v1735_v10 = vpop.permute.xlu2 %1734 }
 0x5bb   : > { %v1740_v41 = vsel %vm1314_vm3, %v1735_v10, 0 }
 0x5bc   : > { %1749 = vmatpush.bf16.msra.mxu2 %v1740_v41 }
 0x5e1   : > { %v1556_v44 = vpop.f32.mrf.mxu3 }
 0x5e2   : > { %v1560_v45 = vpack.c.bf16 %v1556_v44, %v1556_v44  ;;  %v1479_v46 = vpop.f32.mrf.mxu2 }
 0x5e3   : > { %v1483_v47 = vpack.c.bf16 %v1479_v46, %v1479_v46 }
 0x5e4   : > { %2616 = vmatmul.msk.bf16.vlgmr.msrb.gmra.mxu2 %vm1277_vm2, %v1560_v45 }
 0x5e5   : > { %2613 = vmatmul.msk.bf16.vlgmr.msra.gmra.mxu0 %vm1277_vm2, %v1483_v47 }
 0x5e9   : > { %v1558_v48 = vpop.f32.mrf.mxu3 }
 0x5ea   : > { %v1481_v49 = vpop.f32.mrf.mxu2 }
 0x662   : > { %v1499_v50 = vpop.f32.mrf.mxu0 }
 0x663   : > { %v1503_v51 = vadd.f32 %v1499_v50, %v1424_v19  ;;  %v2855_v19 = vld [vmem:[%s4246_s29] ss:$0 sm:$0xff]  ;;  %v1694_v50 = vld [vmem:[%s3755_s7] sm:$0xf] }
 0x667   : > { %v1576_v53 = vpop.f32.mrf.mxu2 }
 0x668   : > { %v1580_v54 = vadd.f32 %v1576_v53, %v1503_v51  ;;  %v1839_v51 = vsel %vm1314_vm3, %v1694_v50, 0 }
 0x669   : > { %1848 = vmatpush.bf16.msrb.mxu2 %v1839_v51 }
 0x66a   : > { %v1585_v55 = vadd.f32 %v2854_v52, %v1580_v54  ;;  %v1501_v56 = vpop.f32.mrf.mxu0 }
 0x66c   : > { %v1586_v57 = vadd.f32 %v1585_v55, %v3832_v3  ;;  %v2688_v3 = vld [vmem:[%s3791_s24 + $0x8] sm:$0xff]  ;;  %s4256_s24 = scalar_lea.vmem [#allocation14], %s3738_s6 }
 0x66d   : > { %1651 = vmatpush.bf16.msrb.mxu0 %v2688_v3 }
 0x66e   : > { %v1589_v58 = vsel %vm1250_vm1, %v1586_v57, 0.0  ;;  %v1593_v59 = vmul.f32 %v1586_v57, %v1586_v57 }
 0x66f   : > { %1590 = vadd.xlane.f32.xlu1 %v1589_v58  ;;  %v1578_v60 = vpop.f32.mrf.mxu2 }
 0x670   : > { %v1594_v61 = vsel %vm1250_vm1, %v1593_v59, 0.0 }
 0x671   : > { %1595 = vadd.xlane.f32.xlu0 %v1594_v61  ;;  %1652 = vmatpush.bf16.msrb.mxu0 %v2687_v2 }
 0x685   : > { %1933 = vrot.lane.b32.xlu0 %v3940_v32, %s3330_s12 }
 0x6e2   : > { %v1591_v4 = vpop.xlane.xlu1 %1590 }
 0x6e3   : > { %v1592_v5 = vmul.f32 0.03125, %v1591_v4 }
 0x6e4   : > { %v1596_v6 = vpop.xlane.xlu0 %1595 }
 0x6e5   : > { %v1598_v7 = vmul.f32 %v1592_v5, %v1592_v5  ;;  %v1597_v8 = vmul.f32 0.03125, %v1596_v6  ;;  %v1600_v18 = vsub.f32 %v1586_v57, %v1592_v5 }
 0x6e7   : > { %v1599_v9 = vsub.f32 %v1597_v8, %v1598_v7 }
 0x6e9   : > { %v1601_v11 = vadd.f32 1e-05, %v1599_v9 }
 0x6eb   : > { %2882 = vrsqrt.f32 %v1601_v11  ;;  %vm1608_vm6 = vweird.f32 %v1601_v11 }
 0x6f1   : > { %v2883_v12 = vpop.eup %2882 }
 0x6f2   : > { %v1603_v13 = vmul.f32 %v2883_v12, %v1601_v11  ;;  %vm1609_vm5 = vweird.f32 %v2883_v12 }
 0x6f3   : > { %vm1610_vm7 = vmor %vm1608_vm6, %vm1609_vm5 }
 0x6f4   : > { %v1604_v14 = vmul.f32 %v2883_v12, %v1603_v13 }
 0x6f6   : > { %v1605_v15 = vmul.f32 0.5, %v1604_v14 }
 0x6f7   : > { %v1934_v55 = vpop.permute.xlu0 %1933 }
 0x6f8   : > { %v1606_v16 = vsub.f32 1.5, %v1605_v15  ;;  %v1939_v57 = vsel %vm1277_vm2, %v1934_v55, 0 }
 0x6fa   : > { %v1607_v17 = vmul.f32 %v2883_v12, %v1606_v16 }
 0x6fc   : > { %v1611_v20 = vsel %vm1610_vm7, %v2883_v12, %v1607_v17 }
 0x6fd   : > { %v1612_v21 = vmul.f32 %v1611_v20, %v1600_v18 }
 0x6ff   : > { %v1616_v23 = vmul.f32 %v2855_v19, %v1612_v21 }
 0x701   : > { %v3929_v24 = vadd.f32 %v2856_v22, %v1616_v23 }
 0x703   : > { %v1621_v25 = vpack.c.bf16 %v3929_v24, %v3929_v24 }
 0x705   : > { %2625 = vmatmul.msk.bf16.vlgmr.msrb.gmra.mxu0 %vm1250_vm1, %v1621_v25 }
 0x782   : > { %v1654_v35 = vpop.f32.mrf.mxu0 }
 0x783   : > { %v1655_v36 = vadd.f32 %v2858_v34, %v1654_v35 }
 0x785   : > { %v1698_v37 = vpack.c.bf16 %v1655_v36, %v1655_v36 }
 0x787   : > { %v1757_v38 = vunpack.c.l.b16 %v1698_v37  ;;  %2635 = vmatmul.msk.bf16.vlgmr.msrb.gmra.mxu3 %vm1277_vm2, %v1698_v37 }
 0x789   : > { %v1758_v39 = vpack.c.b16 %v1757_v38, %v1757_v38 }
 0x78a   : > { %v1656_v40 = vpop.f32.mrf.mxu0 }
 0x78b   : > { %1759 = vrot.lane.b32.xlu2 %v1758_v39, %s3322_s3 }
 0x793   : > { %1856 = vrot.lane.b32.xlu2 %v3940_v32, %s3325_s11 }
 0x79b   : > { %1854 = vrot.lane.b32.xlu2 %v1758_v39, %s3325_s11 }
 0x7e5   : > { %v1760_v58 = vpop.permute.xlu2 %1759 }
 0x7ed   : > { %v1857_v59 = vpop.permute.xlu2 %1856 }
 0x7ee   : > { %v1862_v62 = vsel %vm1277_vm2, %v1857_v59, 0  ;;  %v1697_v59 = vld [vmem:[%s3755_s7 + $0xc] sm:$0xf] }
 0x7f5   : > { %v1855_v63 = vpop.permute.xlu2 %1854 }
 0x80a   : > { %v1715_v42 = vpop.f32.mrf.mxu3 }
 0x80b   : > { %v1719_v43 = vsel %vm1277_vm2, %v1715_v42, -inf }
 0x80c   : > { %1720 = vmax.xlane.f32.xlu1 %v1719_v43 }
 0x812   : > { %v1717_v44 = vpop.f32.mrf.mxu3 }
 0x813   : > { %v1695_v44 = vld [vmem:[%s3755_s7 + $0x4] sm:$0xf] }
 0x87f   : > { %v1721_v45 = vpop.xlane.xlu1 %1720 }
 0x880   : > { %v1722_v46 = vsub.f32 %v1715_v42, %v1721_v45  ;;  %v1820_v45 = vsel %vm1314_vm3, %v1695_v44, 0 }
 0x881   : > { %1829 = vmatpush.bf16.msra.mxu3 %v1820_v45 }
 0x882   : > { %v1723_v47 = vmul.f32 1.442695, %v1722_v46  ;;  %v1696_v46 = vld [vmem:[%s3755_s7 + $0x8] sm:$0xf]  ;;  %s4251_s7 = sld [smem:[#allocation58_spill]] }
 0x884   : > { %2884 = vpow2.f32 %v1723_v47  ;;  %v1915_v47 = vsel %vm1314_vm3, %v1696_v46, 0 }
 0x885   : > { %1924 = vmatpush.bf16.msrb.mxu3 %v1915_v47 }
 0x88a   : > { %v2885_v48 = vpop.eup %2884 }
 0x88b   : > { %v1725_v49 = vsel %vm1277_vm2, %v2885_v48, 0.0 }
 0x88c   : > { %1726 = vadd.xlane.f32.xlu1 %v1725_v49 }
 0x8a5   : > { %1761 = vrot.lane.b32.xlu1 %v3940_v32, %s3322_s3  ;;  %s4252_s3 = scalar_lea.vmem %s4251_s7, %s3769_s16 }
 0x8ad   : > { %1931 = vrot.lane.b32.xlu1 %v1758_v39, %s3330_s12 }
 0x8ff   : > { %v1727_v52 = vpop.xlane.xlu1 %1726 }
 0x900   : > { %2886 = vrcp.f32 %v1727_v52 }
 0x906   : > { %v2887_v53 = vpop.eup %2886 }
 0x907   : > { %v1729_v54 = vmul.f32 %v2887_v53, %v2885_v48 }
 0x909   : > { %v1730_v56 = vpack.c.bf16 %v1729_v54, %v1729_v54 }
 0x90b   : > { %2636 = vmatmul.msk.bf16.vlgmr.msra.gmra.mxu2 %vm1277_vm2, %v1730_v56 }
 0x90c   : > { %1948 = vmatpush.bf16.xpose.msra.mxu2 %v1939_v57 }
 0x917   : > { %v1762_v60 = vpop.permute.xlu1 %1761 }
 0x918   : > { %v1767_v61 = vsel %vm1277_vm2, %v1762_v60, 0  ;;  %v1992_v60 = vsel %vm1314_vm3, %v1697_v59, 0 }
 0x919   : > { %1776 = vmatpush.bf16.xpose.msra.mxu0 %v1767_v61 }
 0x91f   : > { %v1932_v5 = vpop.permute.xlu1 %1931 }
 0x920   : > { %2637 = vmatmul.msk.bf16.vlgmr.msra.gmra.mxu0 %vm1277_vm2, %v1760_v58 }
 0x921   : > { %1871 = vmatpush.bf16.xpose.msrb.mxu0 %v1862_v62 }
 0x930   : > { %2641 = vmatmul.msk.bf16.vlgmr.msrb.gmra.mxu0 %vm1277_vm2, %v1855_v63 }
 0x98e   : > { %v1751_v0 = vpop.f32.mrf.mxu2 }
 0x98f   : > { %v1755_v1 = vpack.c.bf16 %v1751_v0, %v1751_v0 }
 0x991   : > { %2640 = vmatmul.msk.bf16.vlgmr.msrb.gmra.mxu2 %vm1277_vm2, %v1755_v1 }
 0x996   : > { %v1753_v3 = vpop.f32.mrf.mxu2 }
 0x99d   : > { %v1778_v2 = vpop.f32.mrf.mxu0 }
 0x99e   : > { %v1782_v4 = vsel %vm1277_vm2, %v1778_v2, -inf }
 0x99f   : > { %1783 = vmax.xlane.f32.xlu2 %v1782_v4 }
 0x9a1   : > { %2644 = vmatmul.msk.bf16.vlgmr.msra.gmra.mxu2 %vm1277_vm2, %v1932_v5 }
 0x9a5   : > { %v1780_v6 = vpop.f32.mrf.mxu0 }
 0x9a6   : > { %v2859_v6 = vld [vmem:[%s4252_s3] ss:$0 sm:$0xff] }
 0x9ad   : > { %v1873_v7 = vpop.f32.mrf.mxu0 }
 0x9ae   : > { %v1877_v8 = vsel %vm1277_vm2, %v1873_v7, -inf }
 0x9af   : > { %1878 = vmax.xlane.f32.xlu1 %v1877_v8 }
 0x9b5   : > { %v1875_v9 = vpop.f32.mrf.mxu0 }
 0x9c8   : > { %1794 = vrot.lane.b32.xlu1 %v3940_v32, %s3320_s26 }
 0xa12   : > { %v1784_v11 = vpop.xlane.xlu2 %1783 }
 0xa13   : > { %v1785_v12 = vsub.f32 %v1778_v2, %v1784_v11 }
 0xa14   : > { %v3976_v13 = vpop.f32.mrf.mxu2 }
 0xa15   : > { %v1786_v14 = vmul.f32 1.442695, %v1785_v12 }
 0xa17   : > { %2888 = vpow2.f32 %v1786_v14 }
 0xa1c   : > { %v1852_v15 = vpop.f32.mrf.mxu2 }
 0xa1d   : > { %v2889_v16 = vpop.eup %2888 }
 0xa1e   : > { %v1788_v17 = vsel %vm1277_vm2, %v2889_v16, 0.0 }
 0xa1f   : > { %1789 = vadd.xlane.f32.xlu2 %v1788_v17 }
 0xa22   : > { %v1879_v18 = vpop.xlane.xlu1 %1878 }
 0xa23   : > { %v1880_v19 = vsub.f32 %v1873_v7, %v1879_v18 }
 0xa24   : > { %v1950_v20 = vpop.f32.mrf.mxu2 }
 0xa25   : > { %v1881_v21 = vmul.f32 1.442695, %v1880_v19  ;;  %v1954_v22 = vsel %vm1277_vm2, %v1950_v20, -inf }
 0xa26   : > { %1955 = vmax.xlane.f32.xlu0 %v1954_v22  ;;  %v2696_v22 = vld [vmem:[%s3817_s14 + $0x18] sm:$0xff] }
 0xa27   : > { %2890 = vpow2.f32 %v1881_v21  ;;  %2131 = vmatpush.bf16.msrb.mxu2 %v2696_v22 }
 0xa2c   : > { %v1952_v23 = vpop.f32.mrf.mxu2 }
 0xa2d   : > { %v2891_v25 = vpop.eup %2890 }
 0xa2e   : > { %v1883_v26 = vsel %vm1277_vm2, %v2891_v25, 0.0 }
 0xa2f   : > { %1884 = vadd.xlane.f32.xlu2 %v1883_v26 }
 0xa3a   : > { %1889 = vrot.lane.b32.xlu0 %v3940_v32, %s3323_s10  ;;  %v1795_v27 = vpop.permute.xlu1 %1794  ;;  %s4253_s10 = scalar_lea.vmem [#allocation15], %s3751_s18 }
 0xa3b   : > { %v1800_v29 = vsel %vm1314_vm3, %v1795_v27, 0 }
 0xa3c   : > { %1809 = vmatpush.bf16.msra.mxu1 %v1800_v29 }
 0xa92   : > { %v1790_v30 = vpop.xlane.xlu2 %1789 }
 0xa93   : > { %2892 = vrcp.f32 %v1790_v30 }
 0xa99   : > { %v2893_v31 = vpop.eup %2892  ;;  %v1956_v28 = vpop.xlane.xlu0 %1955 }
 0xa9a   : > { %v1792_v33 = vmul.f32 %v2893_v31, %v2889_v16  ;;  %v1957_v34 = vsub.f32 %v1950_v20, %v1956_v28  ;;  %v2692_v16 = vld [vmem:[%s4253_s10 + $0x8] sm:$0xff] }
 0xa9c   : > { %v1793_v35 = vpack.c.bf16 %v1792_v33, %v1792_v33  ;;  %v1958_v36 = vmul.f32 1.442695, %v1957_v34 }
 0xa9e   : > { %2894 = vpow2.f32 %v1958_v36  ;;  %2638 = vmatmul.msk.bf16.vlgmr.msra.gmra.mxu1 %vm1277_vm2, %v1793_v35  ;;  %v2860_v35 = vld [vmem:[%s1197_s8] ss:$0 sm:$0xff] }
 0xaa2   : > { %v1885_v37 = vpop.xlane.xlu2 %1884 }
 0xaa3   : > { %2896 = vrcp.f32 %v1885_v37 }
 0xaa4   : > { %v2895_v38 = vpop.eup %2894 }
 0xaa5   : > { %v1960_v39 = vsel %vm1277_vm2, %v2895_v38, 0.0 }
 0xaa6   : > { %1961 = vadd.xlane.f32.xlu2 %v1960_v39 }
 0xaa9   : > { %v2897_v40 = vpop.eup %2896 }
 0xaaa   : > { %v1887_v10 = vmul.f32 %v2897_v40, %v2891_v25  ;;  %v2695_v25 = vld [vmem:[%s3817_s14 + $0x10] sm:$0xff] }
 0xaab   : > { %2132 = vmatpush.bf16.msrb.mxu2 %v2695_v25 }
 0xaac   : > { %v1890_v41 = vpop.permute.xlu0 %1889  ;;  %v1888_v43 = vpack.c.bf16 %v1887_v10, %v1887_v10 }
 0xaad   : > { %v1895_v42 = vsel %vm1314_vm3, %v1890_v41, 0  ;;  %v2694_v41 = vld [vmem:[%s3817_s14 + $0x8] sm:$0xff] }
 0xaae   : > { %1904 = vmatpush.bf16.msrb.mxu1 %v1895_v42  ;;  %v2693_v42 = vld [vmem:[%s3817_s14] sm:$0xff] }
 0xaaf   : > { %2133 = vmatpush.bf16.msrb.mxu2 %v2694_v41 }
 0xab1   : > { %2642 = vmatmul.msk.bf16.vlgmr.msrb.gmra.mxu1 %vm1277_vm2, %v1888_v43  ;;  %v2862_v43 = vld [vmem:[%s1200_s21] ss:$0 sm:$0xff] }
 0xab2   : > { %2001 = vmatpush.bf16.msra.mxu1 %v1992_v60 }
 0xab3   : > { %2134 = vmatpush.bf16.msrb.mxu2 %v2693_v42 }
 0xabe   : > { %1966 = vrot.lane.b32.xlu2 %v3940_v32, %s3324_s15  ;;  %s4254_s15 = smov %s4253_s10 }
 0xabf   : > { %v2691_v17 = vld [vmem:[%s4254_s15] sm:$0xff] }
 0xb19   : > { %v1962_v48 = vpop.xlane.xlu2 %1961 }
 0xb1a   : > { %2898 = vrcp.f32 %v1962_v48 }
 0xb1b   : > { %v1811_v49 = vpop.f32.mrf.mxu1 }
 0xb1c   : > { %v1815_v50 = vpack.c.bf16 %v1811_v49, %v1811_v49  ;;  %v2863_v49 = vld [vmem:[%s1208_s2] ss:$0 sm:$0xff] }
 0xb1e   : > { %2639 = vmatmul.msk.bf16.vlgmr.msra.gmra.mxu3 %vm1277_vm2, %v1815_v50 }
 0xb1f   : > { %2078 = vmatpush.bf16.msra.mxu3 %v2692_v16 }
 0xb20   : > { %v2899_v51 = vpop.eup %2898 }
 0xb21   : > { %v1964_v52 = vmul.f32 %v2899_v51, %v2895_v38  ;;  %v1967_v53 = vpop.permute.xlu2 %1966  ;;  %v2861_v38 = vld [vmem:[%s4256_s24] ss:$0 sm:$0xff] }
 0xb22   : > { %v1972_v32 = vsel %vm1314_vm3, %v1967_v53, 0 }
 0xb23   : > { %v1965_v54 = vpack.c.bf16 %v1964_v52, %v1964_v52  ;;  %v1813_v55 = vpop.f32.mrf.mxu1  ;;  %1981 = vmatpush.bf16.msra.mxu0 %v1972_v32  ;;  %2079 = vmatpush.bf16.msra.mxu3 %v2691_v17 }
 0xb26   : > { %2645 = vmatmul.msk.bf16.vlgmr.msra.gmra.mxu0 %vm1277_vm2, %v1965_v54 }
 0xb2e   : > { %v1906_v56 = vpop.f32.mrf.mxu1 }
 0xb2f   : > { %v1910_v57 = vpack.c.bf16 %v1906_v56, %v1906_v56 }
 0xb31   : > { %2643 = vmatmul.msk.bf16.vlgmr.msrb.gmra.mxu3 %vm1277_vm2, %v1910_v57 }
 0xb36   : > { %v1908_v58 = vpop.f32.mrf.mxu1 }
 0xba1   : > { %v1831_v61 = vpop.f32.mrf.mxu3 }
 0xba2   : > { %v1851_v3 = vadd.f32 %v3976_v13, %v1831_v61 }
 0xba3   : > { %v1983_v62 = vpop.f32.mrf.mxu0 }
 0xba4   : > { %v1987_v63 = vpack.c.bf16 %v1983_v62, %v1983_v62 }
 0xba6   : > { %2646 = vmatmul.msk.bf16.vlgmr.msra.gmra.mxu1 %vm1277_vm2, %v1987_v63 }
 0xba9   : > { %v1833_v0 = vpop.f32.mrf.mxu3 }
 0xbab   : > { %v1985_v1 = vpop.f32.mrf.mxu0 }
 0xbb4   : > { %v1926_v2 = vpop.f32.mrf.mxu3 }
 0xbb5   : > { %v1930_v4 = vadd.f32 %v1926_v2, %v1851_v3 }
 0xbbc   : > { %v1928_v5 = vpop.f32.mrf.mxu3 }
 0xc23   : > { %v2003_v7 = vpop.f32.mrf.mxu1 }
 0xc24   : > { %v2007_v8 = vadd.f32 %v2003_v7, %v1930_v4 }
 0xc26   : > { %v2012_v9 = vadd.f32 %v2859_v6, %v2007_v8  ;;  %v2864_v6 = vld [vmem:[%s1211_s0] ss:$0 sm:$0xff] }
 0xc27   : > { %v2865_v8 = vld [vmem:[%s1020_s4] ss:$0 sm:$0xff] }
 0xc28   : > { %v2013_v11 = vadd.f32 %v2012_v9, %v3929_v24 }
 0xc2a   : > { %v2016_v12 = vsel %vm1250_vm1, %v2013_v11, 0.0  ;;  %v2020_v14 = vmul.f32 %v2013_v11, %v2013_v11 }
 0xc2b   : > { %v2005_v15 = vpop.f32.mrf.mxu1  ;;  %2017 = vadd.xlane.f32.xlu1 %v2016_v12 }
 0xc2c   : > { %v2021_v13 = vsel %vm1250_vm1, %v2020_v14, 0.0 }
 0xc2d   : > { %2022 = vadd.xlane.f32.xlu0 %v2021_v13 }
 0xc9e   : > { %v2018_v18 = vpop.xlane.xlu1 %2017 }
 0xc9f   : > { %v2019_v19 = vmul.f32 0.03125, %v2018_v18 }
 0xca0   : > { %v2023_v20 = vpop.xlane.xlu0 %2022 }
 0xca1   : > { %v2025_v24 = vmul.f32 %v2019_v19, %v2019_v19  ;;  %v2024_v21 = vmul.f32 0.03125, %v2023_v20  ;;  %v2027_v34 = vsub.f32 %v2013_v11, %v2019_v19 }
 0xca3   : > { %v2026_v23 = vsub.f32 %v2024_v21, %v2025_v24 }
 0xca5   : > { %v2028_v26 = vadd.f32 1e-05, %v2026_v23 }
 0xca7   : > { %2900 = vrsqrt.f32 %v2028_v26  ;;  %vm2035_vm9 = vweird.f32 %v2028_v26 }
 0xcad   : > { %v2901_v27 = vpop.eup %2900 }
 0xcae   : > { %v2030_v29 = vmul.f32 %v2901_v27, %v2028_v26  ;;  %vm2036_vm8 = vweird.f32 %v2901_v27 }
 0xcaf   : > { %vm2037_vm10 = vmor %vm2035_vm9, %vm2036_vm8 }
 0xcb0   : > { %v2031_v30 = vmul.f32 %v2901_v27, %v2030_v29 }
 0xcb2   : > { %v2032_v31 = vmul.f32 0.5, %v2031_v30 }
 0xcb4   : > { %v2033_v28 = vsub.f32 1.5, %v2032_v31 }
 0xcb6   : > { %v2034_v33 = vmul.f32 %v2901_v27, %v2033_v28 }
 0xcb8   : > { %v2038_v36 = vsel %vm2037_vm10, %v2901_v27, %v2034_v33 }
 0xcb9   : > { %v2039_v37 = vmul.f32 %v2038_v36, %v2027_v34 }
 0xcbb   : > { %v2043_v39 = vmul.f32 %v2860_v35, %v2039_v37 }
 0xcbd   : > { %v2047_v40 = vadd.f32 %v2861_v38, %v2043_v39 }
 0xcbf   : > { %v2048_v10 = vpack.c.bf16 %v2047_v40, %v2047_v40 }
 0xcc1   : > { %2655 = vmatmul.msk.bf16.vlgmr.msra.gmra.mxu3 %vm1250_vm1, %v2048_v10 }
 0xd44   : > { %v2081_v44 = vpop.f32.mrf.mxu3 }
 0xd45   : > { %v2082_v45 = vadd.f32 %v2862_v43, %v2081_v44 }
 0xd47   : > { %v2085_v46 = vmax.f32 %v2082_v45, 0.0 }
 0xd49   : > { %v2086_v47 = vpack.c.bf16 %v2085_v46, %v2085_v46 }
 0xd4b   : > { %2672 = vmatmul.msk.bf16.vlgmr.msrb.gmra.mxu2 %vm2123_vm11, %v2086_v47 }
 0xd4c   : > { %v2083_v48 = vpop.f32.mrf.mxu3 }
 0xdce   : > { %v2136_v50 = vpop.f32.mrf.mxu2 }
 0xdcf   : > { %v2137_v51 = vadd.f32 %v2863_v49, %v2136_v50 }
 0xdd1   : > { %v2140_v52 = vadd.f32 %v2137_v51, %v2047_v40 }
 0xdd3   : > { %v2143_v53 = vsel %vm1250_vm1, %v2140_v52, 0.0  ;;  %v2147_v32 = vmul.f32 %v2140_v52, %v2140_v52 }
 0xdd4   : > { %2144 = vadd.xlane.f32.xlu2 %v2143_v53 }
 0xdd5   : > { %v2148_v54 = vsel %vm1250_vm1, %v2147_v32, 0.0 }
 0xdd6   : > { %v2138_v55 = vpop.f32.mrf.mxu2  ;;  %2149 = vadd.xlane.f32.xlu1 %v2148_v54 }
 0xe47   : > { %v2145_v56 = vpop.xlane.xlu2 %2144 }
 0xe48   : > { %v2146_v57 = vmul.f32 0.03125, %v2145_v56 }
 0xe49   : > { %v2150_v58 = vpop.xlane.xlu1 %2149 }
 0xe4a   : > { %v2152_v59 = vmul.f32 %v2146_v57, %v2146_v57  ;;  %v2151_v60 = vmul.f32 0.03125, %v2150_v58  ;;  %v2154_v5 = vsub.f32 %v2140_v52, %v2146_v57 }
 0xe4c   : > { %v2153_v61 = vsub.f32 %v2151_v60, %v2152_v59 }
 0xe4e   : > { %v2155_v62 = vadd.f32 1e-05, %v2153_v61 }
 0xe50   : > { %2902 = vrsqrt.f32 %v2155_v62  ;;  %vm2162_vm13 = vweird.f32 %v2155_v62 }
 0xe56   : > { %v2903_v63 = vpop.eup %2902 }
 0xe57   : > { %v2157_v0 = vmul.f32 %v2903_v63, %v2155_v62  ;;  %vm2163_vm12 = vweird.f32 %v2903_v63 }
 0xe58   : > { %vm2164_vm14 = vmor %vm2162_vm13, %vm2163_vm12 }
 0xe59   : > { %v2158_v1 = vmul.f32 %v2903_v63, %v2157_v0 }
 0xe5b   : > { %v2159_v3 = vmul.f32 0.5, %v2158_v1 }
 0xe5d   : > { %v2160_v2 = vsub.f32 1.5, %v2159_v3 }
 0xe5f   : > { %v2161_v4 = vmul.f32 %v2903_v63, %v2160_v2 }
 0xe61   : > { %v2165_v7 = vsel %vm2164_vm14, %v2903_v63, %v2161_v4 }
 0xe62   : > { %v2166_v9 = vmul.f32 %v2165_v7, %v2154_v5 }
 0xe64   : > { %v2170_v11 = vmul.f32 %v2864_v6, %v2166_v9  ;;  %2179 = sbr.rel (%p2673_p12) target bundleno = 3690 (0xe6a), region = 152 }
 0xe66   : > { %v2174_v12 = vadd.f32 %v2865_v8, %v2170_v11 }
 0xe68   : > { %2175 = vst.msk [vmem:[#allocation2] sm:$0xff] %vm1250_vm1, %v2174_v12 }
 0xe69   : > { %2180 = vst.msk [vmem:[%s1164_s19] sm:$0xff] %vm1250_vm1, %v2174_v12 }
 0xe6a PF: > { %s4261_s27 = sld [smem:[#allocation32_spill]]  ;;  %s2194_s5 = sshll.u32 %s1164_s19, 4  ;;  %s2195_s5 = int_to_ptr.vmem [resolvable:$true] %s2194_s5 }
 0xe6b   : > { %s4262_s0 = sld [smem:[#allocation44_spill]] }
 0xe6c   : > { %s4264_s22 = sld [smem:[#allocation67_spill]] }
 0xe70   : > { %s2675_s23 = sshll.u32 %s4261_s27, 3 }
 0xe71   : > { %s2182_s1 = scalar_lea.sflag [#allocation5], %s4262_s0 }
 0xe72   : > { %s2192_s30 = scalar_lea.hbm %s4264_s22, %s2675_s23  ;;  %s3194_s18 = scalar_lea.hbm %s4264_s22, 16 }
 0xe73   : > { %s2196_s26 = sshll.u32 %s2192_s30, 4  ;;  %s2197_s26 = int_to_ptr.hbm [resolvable:$true] %s2196_s26 }
 0xe74   : > { %s3188_s7 = sshra.s32 %s2197_s26, 4  ;;  %s3189_s7 = int_to_ptr.hbm [resolvable:$true] %s3188_s7 }
 0xe75   : > { %s3190_s3 = scalar_lea.hbm %s3189_s7, 8  ;;  %p3195_p10 = scmp.lt.s32.totalorder %s3189_s7, %s4264_s22 }
 0xe76   : > { %p3191_p13 = scmp.ne.s32.totalorder %s3189_s7, %s3190_s3  ;;  %p3196_p1 = scmp.lt.s32.totalorder %s3194_s18, %s3190_s3 }
 0xe78   : > { %p3192_p0 = pnand %p3191_p13, %p3570_p8  ;;  %p3197_p3 = por %p3196_p1, %p3195_p10 }
 0xe7a   : > { %p3193_p5 = pneg %p3192_p0 }
 0xe7c   : > { %p3198_p6 = pnand %p3197_p3, %p3193_p5 }
 0xe7e   : > { %3201 = shalt.err (!%p3198_p6)
}
 0xe7f   : > { %2715 = dma.vmem_to_hbm [thread:$0]  (%p3570_p8), %s2195_s5, 128, %s2197_s26, %s2182_s1  }
 0xe80 PF: > { %s4265_s25 = sld [smem:[#allocation35_spill]] }
 0xe81   : > { %s4266_s19 = sld [smem:[#allocation28_spill]] }
 0xe86   : > { %p2750_p9 = scmp.ge.s32.totalorder %s4265_s25, 2 }
 0xe87   : > { %s2208_s9 = sand.u32 1, %s4266_s19  }
 0xe88   : > { %p2746_p11 = pnand %p2750_p9, %p3577_p2  ;;  %s2209_s20 = scalar_lea.sflag [#allocation5], %s2208_s9 }
 0xe8a   : > { %p2747_p4 = pneg %p2746_p11 }
 0xe8c   : > { %3271 = dma.done.wait (%p2747_p4), %s2209_s20, 128  }
 0xe8d   : > { %3273 = vsyncadd (%p2747_p4), %s2209_s20, 4294967168  ;;  %s50_s6 = sadd.s32 1, %s4265_s25   ;;  %s4268_s3 = sld [smem:[#allocation26_spill]] }
 0xe8e   : > { %p47_p7 = scmp.ge.s32.totalorder %s50_s6, 6   ;;  %s4269_s28 = sld [smem:[#allocation27_spill]] }
 0xe8f   : > { %s4270_s29 = sld [smem:[#allocation39_spill]] }
 0xe90   : > { %s4271_s30 = sld [smem:[#allocation29_spill]] }
 0xe91   : > { %s4272_s4 = sld [smem:[#allocation30_spill]] }
 0xe92   : > { %s4273_s0 = sld [smem:[#allocation40_spill]]  ;;  %49 = sbr.rel (!%p47_p7) target bundleno = 41 (0x29), region = 296 }
 0xe93   : > { %s4274_s23 = sld [smem:[#allocation33_spill]] }
 0xe94   : > { %s4275_s1 = sld [smem:[#allocation34_spill]] }
 0xe95   : > { %s4276_s5 = sld [smem:[#allocation37_spill]] }
 0xe96   : > { %s4277_s24 = sld [smem:[#allocation38_spill]] }
 0xe97   :  { %2215 = vsyncpa [#allocation4], 1 }
 0xe98   :  { %2217 = vsyncpa [#allocation4 + $0x1], 1 }
 0xe99   :  { %2218 = vsyncpa [#allocation7], 1 }
 0xe9a   :  { %2220 = vsyncpa [#allocation7 + $0x1], 1 }
 0xe9b   :  { %2221 = vsyncpa [#allocation10], 1 }
 0xe9c   :  { %2223 = vsyncpa [#allocation10 + $0x1], 1 }
 0xe9d   :  { %2224 = vsyncpa [#allocation13], 1 }
 0xe9e   :  { %2226 = vsyncpa [#allocation13 + $0x1], 1 }
 0xe9f   :  { %2227 = vsyncpa [#allocation16], 1 }
 0xea0   :  { %2229 = vsyncpa [#allocation16 + $0x1], 1 }
 0xea1   :  { %2230 = vsyncpa [#allocation5], 1 }
 0xea2   :  { %2232 = vsyncpa [#allocation5 + $0x1], 1 }

</bundles_post_ra>
